<compile_context>
chip_gen: v6e
topology: v6e:2x2x1
jax: 0.10.0
libtpu: 0.0.40
codegen_flags: <defaults>
</compile_context>

<pallas_src>
import functools

import jax
import jax.numpy as jnp
from jax import lax
from jax.experimental import pallas as pl
from jax.experimental.pallas import tpu as pltpu


def _compression_kernel(x_ref, wbig_ref, bconv_ref, wlin_ref, blin_ref, alpha_ref, out_ref):
    # conv + global-average-pool fused into one MXU matmul (scale folded into Wbig).
    pooled = jnp.dot(x_ref[...], wbig_ref[...], preferred_element_type=jnp.float32)
    pooled = pooled + bconv_ref[...]                      # (BT, Cout)

    # PReLU with a single shared parameter (SMEM scalar).
    alpha = alpha_ref[0, 0]
    act = jnp.where(pooled >= 0, pooled, pooled * alpha)

    # Linear(in_size, code_size).
    y = jnp.dot(act, wlin_ref[...], preferred_element_type=jnp.float32) + blin_ref[...]
    out_ref[...] = y.astype(out_ref.dtype)                # (BT, code_size), lane-dense store


def _round_up(a, b):
    return ((a + b - 1) // b) * b


def compression_block(x_nchw, params, *, batch_block=256):
    conv_w = params["conv_w"]   # (Cout, Cin, 3, 3)
    conv_b = params["conv_b"]   # (Cout,)
    alpha = params["alpha"]     # (1,)
    lin_w = params["lin_w"]     # (code_size, Cin)
    lin_b = params["lin_b"]     # (code_size,)

    B, C, H, W = x_nchw.shape
    HW = H * W
    Cout = conv_w.shape[0]
    code_size = lin_w.shape[0]

    # ---- Wrapper-side weight packing (tiny, one-time) -----------------------------------
    # Zero-pad clipping masks for each kernel tap: tap dy keeps rows [max(0,dy-1), min(H-1,H-2+dy)].
    h_idx = jnp.arange(H)
    w_idx = jnp.arange(W)
    row_mask = jnp.stack([h_idx <= H - 2, jnp.ones((H,), bool), h_idx >= 1]).astype(jnp.float32)  # (3, H)
    col_mask = jnp.stack([w_idx <= W - 2, jnp.ones((W,), bool), w_idx >= 1]).astype(jnp.float32)  # (3, W)
    spat = row_mask[:, None, :, None] * col_mask[None, :, None, :]                                # (3, 3, H, W)

    # Wbig[ci, h, w, co] = sum_{dy,dx} conv_w[co,ci,dy,dx] * spat[dy,dx,h,w]; fold 1/(H*W) scale.
    wbig = jnp.einsum("oiyx,yxhw->ihwo", conv_w.astype(jnp.float32), spat) * (1.0 / HW)
    wbig = wbig.reshape(C * HW, Cout)                                  # (C*HW, Cout)

    bconv = conv_b.reshape(1, Cout).astype(jnp.float32)
    wlin = lin_w.T.astype(jnp.float32)                                 # (Cout, code_size)
    blin = lin_b.reshape(1, code_size).astype(jnp.float32)
    alpha2d = alpha.reshape(1, 1).astype(jnp.float32)

    # ---- Batch tiling: pad B to a sublane-aligned multiple of the tile, no assert --------
    # TODO(synk): if the upstream activation is bf16, stream it as bf16 (half the HBM bytes)
    # and let preferred_element_type=f32 handle accumulation.
    x = x_nchw.reshape(B, C * HW).astype(jnp.float32)                  # free reshape, lane-dense
    BT = min(batch_block, _round_up(B, 8))                             # sublane-aligned tile
    B_pad = _round_up(B, BT)
    if B_pad != B:
        x = jnp.pad(x, ((0, B_pad - B), (0, 0)))
    grid = (B_pad // BT,)

    def resident(shape):
        return pl.BlockSpec(shape, lambda b: (0,) * len(shape))

    out = pl.pallas_call(
        _compression_kernel,
        out_shape=jax.ShapeDtypeStruct((B_pad, code_size), jnp.float32),
        grid=grid,
        in_specs=[
            pl.BlockSpec((BT, C * HW), lambda b: (b, 0)),              # x: tiled over batch
            resident((C * HW, Cout)),                                  # fused conv+pool weight
            resident((1, Cout)),                                       # conv bias
            resident((Cout, code_size)),                               # linear weight (pre-T)
            resident((1, code_size)),                                  # linear bias
            pl.BlockSpec(memory_space=pltpu.MemorySpace.SMEM),         # PReLU alpha scalar
        ],
        out_specs=pl.BlockSpec((BT, code_size), lambda b: (b, 0)),
        compiler_params=pltpu.CompilerParams(
            dimension_semantics=("parallel",),   # shard batch tiles over v7x's 2 TCs
        ),
    )(x, wbig, bconv, wlin, blin, alpha2d)
    return out[:B]


def reference(x_nchw, params):
    """Pure-JAX reference replicating the PyTorch forward (for correctness check)."""
    conv_w = params["conv_w"]; conv_b = params["conv_b"]
    alpha = params["alpha"]; lin_w = params["lin_w"]; lin_b = params["lin_b"]
    y = lax.conv_general_dilated(
        x_nchw, conv_w, window_strides=(1, 1), padding=((1, 1), (1, 1)),
        dimension_numbers=("NCHW", "OIHW", "NCHW"))
    y = y + conv_b[None, :, None, None]
    y = jnp.mean(y, axis=(2, 3), keepdims=True)               # AdaptiveAvgPool2d((1,1))
    y = jnp.where(y >= 0, y, alpha.reshape(()) * y)            # PReLU (shared param)
    y = y.reshape(y.shape[0], y.shape[1])                      # view(B, C)
    return y @ lin_w.T + lin_b                                 # Linear


if __name__ == "__main__":
    in_size, code_size = 16, 512   # module defaults
    B, H, W = 2, 16, 16

    key = jax.random.PRNGKey(0)
    ks = jax.random.split(key, 5)
    params = {
        "conv_w": 0.1 * jax.random.normal(ks[0], (in_size, in_size, 3, 3), jnp.float32),
        "conv_b": 0.1 * jax.random.normal(ks[1], (in_size,), jnp.float32),
        "alpha": jnp.full((1,), 0.25, jnp.float32),   # nn.PReLU() default init
        "lin_w": 0.1 * jax.random.normal(ks[2], (code_size, in_size), jnp.float32),
        "lin_b": 0.1 * jax.random.normal(ks[3], (code_size,), jnp.float32),
    }
    x = jax.random.normal(ks[4], (B, in_size, H, W), jnp.float32)

    out = jax.block_until_ready(compression_block(x, params))
    ref = jax.block_until_ready(reference(x, params))
    assert out.shape == (B, code_size), out.shape
    assert jnp.allclose(out, ref, rtol=2e-3, atol=2e-3), float(jnp.max(jnp.abs(out - ref)))
    print("KERNEL_OK")
</pallas_src>

<mosaic_0001>
module attributes {stable_mosaic.version = 11 : i64} {
  func.func @_compression_kernel(%arg0: i32, %arg1: memref<8x4096xf32, #tpu.memory_space<vmem>>, %arg2: memref<4096x16xf32, #tpu.memory_space<vmem>>, %arg3: memref<1x16xf32, #tpu.memory_space<vmem>>, %arg4: memref<16x512xf32, #tpu.memory_space<vmem>>, %arg5: memref<1x512xf32, #tpu.memory_space<vmem>>, %arg6: memref<1x1xf32, #tpu.memory_space<smem>>, %arg7: memref<8x512xf32, #tpu.memory_space<vmem>>) attributes {dimension_semantics = [#tpu.dimension_semantics<parallel>], iteration_bounds = array<i64: 1>, scalar_prefetch = 0 : i64, scratch_operands = 0 : i64, tpu.core_type = #tpu.core_type<tc>, window_params = [{transform_indices = @transform_0, window_bounds = array<i64: 8, 4096>}, {pipeline_mode = #tpu.pipeline_mode<synchronous>, transform_indices = @transform_1, window_bounds = array<i64: 4096, 16>}, {pipeline_mode = #tpu.pipeline_mode<synchronous>, transform_indices = @transform_2, window_bounds = array<i64: 1, 16>}, {pipeline_mode = #tpu.pipeline_mode<synchronous>, transform_indices = @transform_3, window_bounds = array<i64: 16, 512>}, {pipeline_mode = #tpu.pipeline_mode<synchronous>, transform_indices = @transform_4, window_bounds = array<i64: 1, 512>}, {transform_indices = @transform_5, window_bounds = array<i64: 1, 1>}, {transform_indices = @transform_6, window_bounds = array<i64: 8, 512>}]} {
    %c0 = arith.constant 0 : index
    %c0_0 = arith.constant 0 : index
    %0 = vector.load %arg1[%c0, %c0_0] : memref<8x4096xf32, #tpu.memory_space<vmem>>, vector<8x4096xf32>
    %c0_1 = arith.constant 0 : index
    %c0_2 = arith.constant 0 : index
    %1 = vector.load %arg2[%c0_1, %c0_2] : memref<4096x16xf32, #tpu.memory_space<vmem>>, vector<4096x16xf32>
    %cst = arith.constant dense<0.000000e+00> : vector<8x16xf32>
    %2 = tpu.matmul %0, %1, %cst {dimension_numbers = #tpu.dot_dimension_numbers<[1], [0], [0], [1], [0, 0, 1, 1], [], []>} : vector<8x4096xf32>, vector<4096x16xf32>, vector<8x16xf32> -> vector<8x16xf32>
    %c0_3 = arith.constant 0 : index
    %c0_4 = arith.constant 0 : index
    %3 = vector.load %arg3[%c0_3, %c0_4] : memref<1x16xf32, #tpu.memory_space<vmem>>, vector<1x16xf32>
    %4 = vector.broadcast %3 : vector<1x16xf32> to vector<8x16xf32>
    %5 = arith.addf %2, %4 : vector<8x16xf32>
    %c0_5 = arith.constant 0 : index
    %c0_6 = arith.constant 0 : index
    %6 = memref.load %arg6[%c0_5, %c0_6] : memref<1x1xf32, #tpu.memory_space<smem>>
    %cst_7 = arith.constant 0.000000e+00 : f32
    %7 = vector.broadcast %cst_7 : f32 to vector<8x16xf32>
    %8 = arith.cmpf oge, %5, %7 : vector<8x16xf32>
    %9 = vector.broadcast %6 : f32 to vector<8x16xf32>
    %10 = arith.mulf %5, %9 : vector<8x16xf32>
    %11 = arith.select %8, %5, %10 : vector<8x16xi1>, vector<8x16xf32>
    %c0_8 = arith.constant 0 : index
    %c0_9 = arith.constant 0 : index
    %12 = vector.load %arg4[%c0_8, %c0_9] : memref<16x512xf32, #tpu.memory_space<vmem>>, vector<16x512xf32>
    %cst_10 = arith.constant dense<0.000000e+00> : vector<8x512xf32>
    %13 = tpu.matmul %11, %12, %cst_10 {dimension_numbers = #tpu.dot_dimension_numbers<[1], [0], [0], [1], [0, 0, 1, 1], [], []>} : vector<8x16xf32>, vector<16x512xf32>, vector<8x512xf32> -> vector<8x512xf32>
    %c0_11 = arith.constant 0 : index
    %c0_12 = arith.constant 0 : index
    %14 = vector.load %arg5[%c0_11, %c0_12] : memref<1x512xf32, #tpu.memory_space<vmem>>, vector<1x512xf32>
    %15 = vector.broadcast %14 : vector<1x512xf32> to vector<8x512xf32>
    %16 = arith.addf %13, %15 : vector<8x512xf32>
    %c0_13 = arith.constant 0 : index
    %c0_14 = arith.constant 0 : index
    %17 = vector.load %arg7[%c0_13, %c0_14] : memref<8x512xf32, #tpu.memory_space<vmem>>, vector<8x512xf32>
    tpu.vector_store %arg7[%c0_13, %c0_14], %16 {strides = array<i32>} : memref<8x512xf32, #tpu.memory_space<vmem>>, vector<8x512xf32>,
    return
  }
  func.func @transform_0(%arg0: i32) -> (i32, i32) {
    %c0_i32 = arith.constant 0 : i32
    %c0_i32_0 = arith.constant 0 : i32
    return %arg0, %c0_i32 : i32, i32
  }
  func.func @transform_1(%arg0: i32) -> (i32, i32) {
    %c0_i32 = arith.constant 0 : i32
    %c0_i32_0 = arith.constant 0 : i32
    %c0_i32_1 = arith.constant 0 : i32
    return %c0_i32, %c0_i32_0 : i32, i32
  }
  func.func @transform_2(%arg0: i32) -> (i32, i32) {
    %c0_i32 = arith.constant 0 : i32
    %c0_i32_0 = arith.constant 0 : i32
    %c0_i32_1 = arith.constant 0 : i32
    return %c0_i32, %c0_i32_0 : i32, i32
  }
  func.func @transform_3(%arg0: i32) -> (i32, i32) {
    %c0_i32 = arith.constant 0 : i32
    %c0_i32_0 = arith.constant 0 : i32
    %c0_i32_1 = arith.constant 0 : i32
    return %c0_i32, %c0_i32_0 : i32, i32
  }
  func.func @transform_4(%arg0: i32) -> (i32, i32) {
    %c0_i32 = arith.constant 0 : i32
    %c0_i32_0 = arith.constant 0 : i32
    %c0_i32_1 = arith.constant 0 : i32
    return %c0_i32, %c0_i32_0 : i32, i32
  }
  func.func @transform_5(%arg0: i32) -> (i32, i32) {
    %c0_i32 = arith.constant 0 : i32
    %c0_i32_0 = arith.constant 0 : i32
    %c0_i32_1 = arith.constant 0 : i32
    return %c0_i32, %c0_i32_0 : i32, i32
  }
  func.func @transform_6(%arg0: i32) -> (i32, i32) {
    %c0_i32 = arith.constant 0 : i32
    %c0_i32_0 = arith.constant 0 : i32
    return %arg0, %c0_i32 : i32, i32
  }
}

</mosaic_0001>

<bundles_post_ra>
// kernel: tpu_custom_call.1
= control target key start
LH: loop header
LB: loop body
LE: loop exit
PB: predicated region body
PF: predicated region fallthrough
CT: control target
= control target key end

     0   :  { %s4187_s0 = inlined_call_operand.vmem [shape: f32[8,4096], index: 0, kind: input, shape index: {}]   ;;  %s4188_s1 = inlined_call_operand.vmem [shape: f32[4096,16], index: 1, kind: input, shape index: {}]   ;;  %s4189_s2 = inlined_call_operand.vmem [shape: f32[1,16], index: 2, kind: input, shape index: {}]   ;;  %s4190_s3 = inlined_call_operand.vmem [shape: f32[16,512], index: 3, kind: input, shape index: {}]   ;;  %s4191_s4 = inlined_call_operand.vmem [shape: f32[1,512], index: 4, kind: input, shape index: {}]   ;;  %s4192_s5 = inlined_call_operand.<no memory space> [shape: f32[1,1], index: 5, kind: input, shape index: {}]   ;;  %s4193_s6 = inlined_call_operand.hbm [shape: f32[8,512], index: 6, kind: output, shape index: {}]  }
   0x1   :  { %v88_v0 = vld [vmem:[%s4188_s1 + $0xf8] sm:$0xff]  ;;  %v87_v4 = vld [vmem:[%s4188_s1 + $0xf0] sm:$0xff]  ;;  %v86_v8 = vld [vmem:[%s4188_s1 + $0xe8] sm:$0xff] }
   0x2   :  { %v120_v1 = vld [vmem:[%s4188_s1 + $0x1f8] sm:$0xff]  ;;  %1898 = vmatprep.subr.mxu0 %v88_v0  ;;  %v119_v5 = vld [vmem:[%s4188_s1 + $0x1f0] sm:$0xff]  ;;  %v118_v9 = vld [vmem:[%s4188_s1 + $0x1e8] sm:$0xff] }
   0x3   :  { %v72_v2 = vld [vmem:[%s4188_s1 + $0x78] sm:$0xff]  ;;  %1933 = vmatprep.subr.mxu1 %v120_v1  ;;  %v71_v6 = vld [vmem:[%s4188_s1 + $0x70] sm:$0xff]  ;;  %v70_v10 = vld [vmem:[%s4188_s1 + $0x68] sm:$0xff] }
   0x4   :  { %v104_v3 = vld [vmem:[%s4188_s1 + $0x178] sm:$0xff]  ;;  %1899 = vmatpush3.msra.mxu0 %v72_v2  ;;  %v103_v7 = vld [vmem:[%s4188_s1 + $0x170] sm:$0xff]  ;;  %v102_v11 = vld [vmem:[%s4188_s1 + $0x168] sm:$0xff] }
   0x5   :  { %1934 = vmatpush3.msra.mxu1 %v104_v3  ;;  %1900 = vmatprep.subr.mxu0 %v87_v4  ;;  %v85_v12 = vld [vmem:[%s4188_s1 + $0xe0] sm:$0xff]  ;;  %v84_v16 = vld [vmem:[%s4188_s1 + $0xd8] sm:$0xff]  ;;  %v83_v20 = vld [vmem:[%s4188_s1 + $0xd0] sm:$0xff] }
   0x6   :  { %1935 = vmatprep.subr.mxu1 %v119_v5  ;;  %1901 = vmatpush3.msra.mxu0 %v71_v6  ;;  %v117_v13 = vld [vmem:[%s4188_s1 + $0x1e0] sm:$0xff]  ;;  %v116_v17 = vld [vmem:[%s4188_s1 + $0x1d8] sm:$0xff]  ;;  %v115_v21 = vld [vmem:[%s4188_s1 + $0x1d0] sm:$0xff] }
   0x7   :  { %1936 = vmatpush3.msra.mxu1 %v103_v7  ;;  %1902 = vmatprep.subr.mxu0 %v86_v8  ;;  %v69_v14 = vld [vmem:[%s4188_s1 + $0x60] sm:$0xff]  ;;  %v68_v18 = vld [vmem:[%s4188_s1 + $0x58] sm:$0xff]  ;;  %v67_v22 = vld [vmem:[%s4188_s1 + $0x50] sm:$0xff] }
   0x8   :  { %1937 = vmatprep.subr.mxu1 %v118_v9  ;;  %v101_v15 = vld [vmem:[%s4188_s1 + $0x160] sm:$0xff]  ;;  %1903 = vmatpush3.msra.mxu0 %v70_v10  ;;  %v100_v19 = vld [vmem:[%s4188_s1 + $0x158] sm:$0xff]  ;;  %v99_v23 = vld [vmem:[%s4188_s1 + $0x150] sm:$0xff] }
   0x9   :  { %1938 = vmatpush3.msra.mxu1 %v102_v11  ;;  %1904 = vmatprep.subr.mxu0 %v85_v12  ;;  %v82_v24 = vld [vmem:[%s4188_s1 + $0xc8] sm:$0xff]  ;;  %v81_v28 = vld [vmem:[%s4188_s1 + $0xc0] sm:$0xff]  ;;  %v80_v32 = vld [vmem:[%s4188_s1 + $0xb8] sm:$0xff] }
   0xa   :  { %1939 = vmatprep.subr.mxu1 %v117_v13  ;;  %1905 = vmatpush3.msra.mxu0 %v69_v14  ;;  %v114_v25 = vld [vmem:[%s4188_s1 + $0x1c8] sm:$0xff]  ;;  %v113_v29 = vld [vmem:[%s4188_s1 + $0x1c0] sm:$0xff]  ;;  %v112_v33 = vld [vmem:[%s4188_s1 + $0x1b8] sm:$0xff] }
   0xb   :  { %1940 = vmatpush3.msra.mxu1 %v101_v15  ;;  %1906 = vmatprep.subr.mxu0 %v84_v16  ;;  %v66_v26 = vld [vmem:[%s4188_s1 + $0x48] sm:$0xff]  ;;  %v65_v30 = vld [vmem:[%s4188_s1 + $0x40] sm:$0xff]  ;;  %v64_v34 = vld [vmem:[%s4188_s1 + $0x38] sm:$0xff] }
   0xc   :  { %1941 = vmatprep.subr.mxu1 %v116_v17  ;;  %1907 = vmatpush3.msra.mxu0 %v68_v18  ;;  %v98_v27 = vld [vmem:[%s4188_s1 + $0x148] sm:$0xff]  ;;  %v97_v31 = vld [vmem:[%s4188_s1 + $0x140] sm:$0xff]  ;;  %v96_v35 = vld [vmem:[%s4188_s1 + $0x138] sm:$0xff] }
   0xd   :  { %1942 = vmatpush3.msra.mxu1 %v100_v19  ;;  %1908 = vmatprep.subr.mxu0 %v83_v20  ;;  %v79_v36 = vld [vmem:[%s4188_s1 + $0xb0] sm:$0xff]  ;;  %v78_v40 = vld [vmem:[%s4188_s1 + $0xa8] sm:$0xff]  ;;  %v77_v44 = vld [vmem:[%s4188_s1 + $0xa0] sm:$0xff] }
   0xe   :  { %1943 = vmatprep.subr.mxu1 %v115_v21  ;;  %1909 = vmatpush3.msra.mxu0 %v67_v22  ;;  %v111_v37 = vld [vmem:[%s4188_s1 + $0x1b0] sm:$0xff]  ;;  %v110_v41 = vld [vmem:[%s4188_s1 + $0x1a8] sm:$0xff]  ;;  %v109_v45 = vld [vmem:[%s4188_s1 + $0x1a0] sm:$0xff] }
   0xf   :  { %1944 = vmatpush3.msra.mxu1 %v99_v23  ;;  %1910 = vmatprep.subr.mxu0 %v82_v24  ;;  %v63_v38 = vld [vmem:[%s4188_s1 + $0x30] sm:$0xff]  ;;  %v62_v42 = vld [vmem:[%s4188_s1 + $0x28] sm:$0xff]  ;;  %v61_v46 = vld [vmem:[%s4188_s1 + $0x20] sm:$0xff] }
  0x10   :  { %1945 = vmatprep.subr.mxu1 %v114_v25  ;;  %1911 = vmatpush3.msra.mxu0 %v66_v26  ;;  %v95_v39 = vld [vmem:[%s4188_s1 + $0x130] sm:$0xff]  ;;  %v94_v43 = vld [vmem:[%s4188_s1 + $0x128] sm:$0xff]  ;;  %v93_v47 = vld [vmem:[%s4188_s1 + $0x120] sm:$0xff] }
  0x11   :  { %1946 = vmatpush3.msra.mxu1 %v98_v27  ;;  %1912 = vmatprep.subr.mxu0 %v81_v28  ;;  %v76_v48 = vld [vmem:[%s4188_s1 + $0x98] sm:$0xff]  ;;  %v75_v52 = vld [vmem:[%s4188_s1 + $0x90] sm:$0xff]  ;;  %v74_v56 = vld [vmem:[%s4188_s1 + $0x88] sm:$0xff] }
  0x12   :  { %1947 = vmatprep.subr.mxu1 %v113_v29  ;;  %1913 = vmatpush3.msra.mxu0 %v65_v30  ;;  %v108_v49 = vld [vmem:[%s4188_s1 + $0x198] sm:$0xff]  ;;  %v107_v53 = vld [vmem:[%s4188_s1 + $0x190] sm:$0xff]  ;;  %v106_v57 = vld [vmem:[%s4188_s1 + $0x188] sm:$0xff] }
  0x13   :  { %1948 = vmatpush3.msra.mxu1 %v97_v31  ;;  %1914 = vmatprep.subr.mxu0 %v80_v32  ;;  %v60_v50 = vld [vmem:[%s4188_s1 + $0x18] sm:$0xff]  ;;  %v59_v54 = vld [vmem:[%s4188_s1 + $0x10] sm:$0xff]  ;;  %v58_v58 = vld [vmem:[%s4188_s1 + $0x8] sm:$0xff] }
  0x14   :  { %1949 = vmatprep.subr.mxu1 %v112_v33  ;;  %1915 = vmatpush3.msra.mxu0 %v64_v34  ;;  %v92_v51 = vld [vmem:[%s4188_s1 + $0x118] sm:$0xff]  ;;  %v91_v55 = vld [vmem:[%s4188_s1 + $0x110] sm:$0xff]  ;;  %v90_v59 = vld [vmem:[%s4188_s1 + $0x108] sm:$0xff] }
  0x15   :  { %1950 = vmatpush3.msra.mxu1 %v96_v35  ;;  %1916 = vmatprep.subr.mxu0 %v79_v36  ;;  %v73_v60 = vld [vmem:[%s4188_s1 + $0x80] sm:$0xff]  ;;  %v26_v63 = vld [vmem:[%s4187_s0 + $0x8] sm:$0xff]  ;;  %v28_v2 = vld [vmem:[%s4187_s0 + $0x18] sm:$0xff] }
  0x16   :  { %1951 = vmatprep.subr.mxu1 %v111_v37  ;;  %1917 = vmatpush3.msra.mxu0 %v63_v38  ;;  %v105_v61 = vld [vmem:[%s4188_s1 + $0x180] sm:$0xff]  ;;  %v152_v3 = vld [vmem:[%s4188_s1 + $0x2f8] sm:$0xff]  ;;  %v27_v5 = vld [vmem:[%s4187_s0 + $0x10] sm:$0xff] }
  0x17   :  { %1952 = vmatpush3.msra.mxu1 %v95_v39  ;;  %1918 = vmatprep.subr.mxu0 %v78_v40  ;;  %v57_v62 = vld [vmem:[%s4188_s1] sm:$0xff]  ;;  %v184_v4 = vld [vmem:[%s4188_s1 + $0x3f8] sm:$0xff]  ;;  %v151_v8 = vld [vmem:[%s4188_s1 + $0x2f0] sm:$0xff] }
  0x18   :  { %1953 = vmatprep.subr.mxu1 %v110_v41  ;;  %1919 = vmatpush3.msra.mxu0 %v62_v42  ;;  %v89_v0 = vld [vmem:[%s4188_s1 + $0x100] sm:$0xff]  ;;  %v136_v6 = vld [vmem:[%s4188_s1 + $0x278] sm:$0xff]  ;;  %v183_v9 = vld [vmem:[%s4188_s1 + $0x3f0] sm:$0xff] }
  0x19   :  { %1954 = vmatpush3.msra.mxu1 %v94_v43  ;;  %1920 = vmatprep.subr.mxu0 %v77_v44  ;;  %v25_v1 = vld [vmem:[%s4187_s0] sm:$0xff]  ;;  %v168_v7 = vld [vmem:[%s4188_s1 + $0x378] sm:$0xff]  ;;  %v135_v10 = vld [vmem:[%s4188_s1 + $0x270] sm:$0xff] }
  0x1a   :  { %1955 = vmatprep.subr.mxu1 %v109_v45  ;;  %1921 = vmatpush3.msra.mxu0 %v61_v46  ;;  %v167_v11 = vld [vmem:[%s4188_s1 + $0x370] sm:$0xff]  ;;  %v150_v12 = vld [vmem:[%s4188_s1 + $0x2e8] sm:$0xff]  ;;  %v149_v16 = vld [vmem:[%s4188_s1 + $0x2e0] sm:$0xff] }
  0x1b   :  { %1956 = vmatpush3.msra.mxu1 %v93_v47  ;;  %1922 = vmatprep.subr.mxu0 %v76_v48  ;;  %v182_v13 = vld [vmem:[%s4188_s1 + $0x3e8] sm:$0xff]  ;;  %v181_v17 = vld [vmem:[%s4188_s1 + $0x3e0] sm:$0xff]  ;;  %v148_v20 = vld [vmem:[%s4188_s1 + $0x2d8] sm:$0xff] }
  0x1c   :  { %1957 = vmatprep.subr.mxu1 %v108_v49  ;;  %1923 = vmatpush3.msra.mxu0 %v60_v50  ;;  %v134_v14 = vld [vmem:[%s4188_s1 + $0x268] sm:$0xff]  ;;  %v133_v18 = vld [vmem:[%s4188_s1 + $0x260] sm:$0xff]  ;;  %v180_v21 = vld [vmem:[%s4188_s1 + $0x3d8] sm:$0xff] }
  0x1d   :  { %1958 = vmatpush3.msra.mxu1 %v92_v51  ;;  %1924 = vmatprep.subr.mxu0 %v75_v52  ;;  %v166_v15 = vld [vmem:[%s4188_s1 + $0x368] sm:$0xff]  ;;  %v165_v19 = vld [vmem:[%s4188_s1 + $0x360] sm:$0xff]  ;;  %v132_v22 = vld [vmem:[%s4188_s1 + $0x258] sm:$0xff] }
  0x1e   :  { %1959 = vmatprep.subr.mxu1 %v107_v53  ;;  %1925 = vmatpush3.msra.mxu0 %v59_v54  ;;  %v164_v23 = vld [vmem:[%s4188_s1 + $0x358] sm:$0xff]  ;;  %v147_v24 = vld [vmem:[%s4188_s1 + $0x2d0] sm:$0xff]  ;;  %v146_v28 = vld [vmem:[%s4188_s1 + $0x2c8] sm:$0xff] }
  0x1f   :  { %1960 = vmatpush3.msra.mxu1 %v91_v55  ;;  %1926 = vmatprep.subr.mxu0 %v74_v56  ;;  %v179_v25 = vld [vmem:[%s4188_s1 + $0x3d0] sm:$0xff]  ;;  %v178_v29 = vld [vmem:[%s4188_s1 + $0x3c8] sm:$0xff]  ;;  %v145_v32 = vld [vmem:[%s4188_s1 + $0x2c0] sm:$0xff] }
  0x20   :  { %1961 = vmatprep.subr.mxu1 %v106_v57  ;;  %1927 = vmatpush3.msra.mxu0 %v58_v58  ;;  %v131_v26 = vld [vmem:[%s4188_s1 + $0x250] sm:$0xff]  ;;  %v130_v30 = vld [vmem:[%s4188_s1 + $0x248] sm:$0xff]  ;;  %v177_v33 = vld [vmem:[%s4188_s1 + $0x3c0] sm:$0xff] }
  0x21   :  { %1962 = vmatpush3.msra.mxu1 %v90_v59  ;;  %1928 = vmatprep.subr.mxu0 %v73_v60  ;;  %v163_v27 = vld [vmem:[%s4188_s1 + $0x350] sm:$0xff]  ;;  %v162_v31 = vld [vmem:[%s4188_s1 + $0x348] sm:$0xff]  ;;  %v129_v34 = vld [vmem:[%s4188_s1 + $0x240] sm:$0xff] }
  0x22   :  { %1963 = vmatprep.subr.mxu1 %v105_v61  ;;  %1929 = vmatpush3.msra.mxu0 %v57_v62  ;;  %v161_v35 = vld [vmem:[%s4188_s1 + $0x340] sm:$0xff]  ;;  %v144_v36 = vld [vmem:[%s4188_s1 + $0x2b8] sm:$0xff]  ;;  %v143_v40 = vld [vmem:[%s4188_s1 + $0x2b0] sm:$0xff] }
  0x23   :  { %640 = vmatprep.mubr.f32.mxu0 %v26_v63  ;;  %1964 = vmatpush3.msra.mxu1 %v89_v0  ;;  %v176_v37 = vld [vmem:[%s4188_s1 + $0x3b8] sm:$0xff]  ;;  %v175_v41 = vld [vmem:[%s4188_s1 + $0x3b0] sm:$0xff]  ;;  %v142_v44 = vld [vmem:[%s4188_s1 + $0x2a8] sm:$0xff] }
  0x24   :  { %641 = vmatmul.mubr.f32.vlgmr.msra.gmra.mxu0 %v25_v1  ;;  %710 = vmatprep.mubr.f32.mxu1 %v28_v2  ;;  %v128_v38 = vld [vmem:[%s4188_s1 + $0x238] sm:$0xff]  ;;  %v127_v42 = vld [vmem:[%s4188_s1 + $0x230] sm:$0xff]  ;;  %v174_v45 = vld [vmem:[%s4188_s1 + $0x3a8] sm:$0xff] }
  0x25   :  { %1968 = vmatprep.subr.mxu0 %v152_v3  ;;  %2003 = vmatprep.subr.mxu1 %v184_v4  ;;  %v160_v39 = vld [vmem:[%s4188_s1 + $0x338] sm:$0xff]  ;;  %v159_v43 = vld [vmem:[%s4188_s1 + $0x330] sm:$0xff]  ;;  %v126_v46 = vld [vmem:[%s4188_s1 + $0x228] sm:$0xff] }
  0x26   :  { %711 = vmatmul.mubr.f32.vlgmr.msra.gmra.mxu1 %v27_v5  ;;  %1969 = vmatpush3.msra.mxu0 %v136_v6  ;;  %v158_v47 = vld [vmem:[%s4188_s1 + $0x328] sm:$0xff]  ;;  %v141_v48 = vld [vmem:[%s4188_s1 + $0x2a0] sm:$0xff]  ;;  %v140_v52 = vld [vmem:[%s4188_s1 + $0x298] sm:$0xff] }
  0x27   :  { %2004 = vmatpush3.msra.mxu1 %v168_v7  ;;  %1970 = vmatprep.subr.mxu0 %v151_v8  ;;  %v173_v49 = vld [vmem:[%s4188_s1 + $0x3a0] sm:$0xff]  ;;  %v172_v53 = vld [vmem:[%s4188_s1 + $0x398] sm:$0xff]  ;;  %v139_v56 = vld [vmem:[%s4188_s1 + $0x290] sm:$0xff] }
  0x28   :  { %2005 = vmatprep.subr.mxu1 %v183_v9  ;;  %1971 = vmatpush3.msra.mxu0 %v135_v10  ;;  %v125_v50 = vld [vmem:[%s4188_s1 + $0x220] sm:$0xff]  ;;  %v124_v54 = vld [vmem:[%s4188_s1 + $0x218] sm:$0xff]  ;;  %v171_v57 = vld [vmem:[%s4188_s1 + $0x390] sm:$0xff] }
  0x29   :  { %2006 = vmatpush3.msra.mxu1 %v167_v11  ;;  %1972 = vmatprep.subr.mxu0 %v150_v12  ;;  %v157_v51 = vld [vmem:[%s4188_s1 + $0x320] sm:$0xff]  ;;  %v156_v55 = vld [vmem:[%s4188_s1 + $0x318] sm:$0xff]  ;;  %v123_v58 = vld [vmem:[%s4188_s1 + $0x210] sm:$0xff] }
  0x2a   :  { %2007 = vmatprep.subr.mxu1 %v182_v13  ;;  %1973 = vmatpush3.msra.mxu0 %v134_v14  ;;  %v155_v59 = vld [vmem:[%s4188_s1 + $0x310] sm:$0xff]  ;;  %v138_v60 = vld [vmem:[%s4188_s1 + $0x288] sm:$0xff]  ;;  %v137_v0 = vld [vmem:[%s4188_s1 + $0x280] sm:$0xff] }
  0x2b   :  { %2008 = vmatpush3.msra.mxu1 %v166_v15  ;;  %1974 = vmatprep.subr.mxu0 %v149_v16  ;;  %v170_v61 = vld [vmem:[%s4188_s1 + $0x388] sm:$0xff]  ;;  %v169_v1 = vld [vmem:[%s4188_s1 + $0x380] sm:$0xff]  ;;  %v32_v6 = vld [vmem:[%s4187_s0 + $0x38] sm:$0xff] }
  0x2c   :  { %2009 = vmatprep.subr.mxu1 %v181_v17  ;;  %1975 = vmatpush3.msra.mxu0 %v133_v18  ;;  %v122_v62 = vld [vmem:[%s4188_s1 + $0x208] sm:$0xff]  ;;  %v121_v2 = vld [vmem:[%s4188_s1 + $0x200] sm:$0xff]  ;;  %v216_v7 = vld [vmem:[%s4188_s1 + $0x4f8] sm:$0xff] }
  0x2d   :  { %2010 = vmatpush3.msra.mxu1 %v165_v19  ;;  %1976 = vmatprep.subr.mxu0 %v148_v20  ;;  %v154_v63 = vld [vmem:[%s4188_s1 + $0x308] sm:$0xff]  ;;  %v153_v4 = vld [vmem:[%s4188_s1 + $0x300] sm:$0xff]  ;;  %v248_v8 = vld [vmem:[%s4188_s1 + $0x5f8] sm:$0xff] }
  0x2e   :  { %2011 = vmatprep.subr.mxu1 %v180_v21  ;;  %1977 = vmatpush3.msra.mxu0 %v132_v22  ;;  %v30_v3 = vld [vmem:[%s4187_s0 + $0x28] sm:$0xff]  ;;  %v29_v5 = vld [vmem:[%s4187_s0 + $0x20] sm:$0xff]  ;;  %v31_v9 = vld [vmem:[%s4187_s0 + $0x30] sm:$0xff] }
  0x2f   :  { %2012 = vmatpush3.msra.mxu1 %v164_v23  ;;  %1978 = vmatprep.subr.mxu0 %v147_v24  ;;  %v200_v10 = vld [vmem:[%s4188_s1 + $0x478] sm:$0xff]  ;;  %v215_v12 = vld [vmem:[%s4188_s1 + $0x4f0] sm:$0xff]  ;;  %v214_v16 = vld [vmem:[%s4188_s1 + $0x4e8] sm:$0xff] }
  0x30   :  { %2013 = vmatprep.subr.mxu1 %v179_v25  ;;  %1979 = vmatpush3.msra.mxu0 %v131_v26  ;;  %v232_v11 = vld [vmem:[%s4188_s1 + $0x578] sm:$0xff]  ;;  %v247_v13 = vld [vmem:[%s4188_s1 + $0x5f0] sm:$0xff]  ;;  %v246_v17 = vld [vmem:[%s4188_s1 + $0x5e8] sm:$0xff] }
  0x31   :  { %2014 = vmatpush3.msra.mxu1 %v163_v27  ;;  %1980 = vmatprep.subr.mxu0 %v146_v28  ;;  %v199_v14 = vld [vmem:[%s4188_s1 + $0x470] sm:$0xff]  ;;  %v198_v18 = vld [vmem:[%s4188_s1 + $0x468] sm:$0xff]  ;;  %v213_v20 = vld [vmem:[%s4188_s1 + $0x4e0] sm:$0xff] }
  0x32   :  { %2015 = vmatprep.subr.mxu1 %v178_v29  ;;  %1981 = vmatpush3.msra.mxu0 %v130_v30  ;;  %v231_v15 = vld [vmem:[%s4188_s1 + $0x570] sm:$0xff]  ;;  %v230_v19 = vld [vmem:[%s4188_s1 + $0x568] sm:$0xff]  ;;  %v245_v21 = vld [vmem:[%s4188_s1 + $0x5e0] sm:$0xff] }
  0x33   :  { %2016 = vmatpush3.msra.mxu1 %v162_v31  ;;  %1982 = vmatprep.subr.mxu0 %v145_v32  ;;  %v197_v22 = vld [vmem:[%s4188_s1 + $0x460] sm:$0xff]  ;;  %v212_v24 = vld [vmem:[%s4188_s1 + $0x4d8] sm:$0xff]  ;;  %v211_v28 = vld [vmem:[%s4188_s1 + $0x4d0] sm:$0xff] }
  0x34   :  { %2017 = vmatprep.subr.mxu1 %v177_v33  ;;  %1983 = vmatpush3.msra.mxu0 %v129_v34  ;;  %v229_v23 = vld [vmem:[%s4188_s1 + $0x560] sm:$0xff]  ;;  %v244_v25 = vld [vmem:[%s4188_s1 + $0x5d8] sm:$0xff]  ;;  %v243_v29 = vld [vmem:[%s4188_s1 + $0x5d0] sm:$0xff] }
  0x35   :  { %2018 = vmatpush3.msra.mxu1 %v161_v35  ;;  %1984 = vmatprep.subr.mxu0 %v144_v36  ;;  %v196_v26 = vld [vmem:[%s4188_s1 + $0x458] sm:$0xff]  ;;  %v195_v30 = vld [vmem:[%s4188_s1 + $0x450] sm:$0xff]  ;;  %v210_v32 = vld [vmem:[%s4188_s1 + $0x4c8] sm:$0xff] }
  0x36   :  { %2019 = vmatprep.subr.mxu1 %v176_v37  ;;  %1985 = vmatpush3.msra.mxu0 %v128_v38  ;;  %v228_v27 = vld [vmem:[%s4188_s1 + $0x558] sm:$0xff]  ;;  %v227_v31 = vld [vmem:[%s4188_s1 + $0x550] sm:$0xff]  ;;  %v242_v33 = vld [vmem:[%s4188_s1 + $0x5c8] sm:$0xff] }
  0x37   :  { %2020 = vmatpush3.msra.mxu1 %v160_v39  ;;  %1986 = vmatprep.subr.mxu0 %v143_v40  ;;  %v194_v34 = vld [vmem:[%s4188_s1 + $0x448] sm:$0xff]  ;;  %v209_v36 = vld [vmem:[%s4188_s1 + $0x4c0] sm:$0xff]  ;;  %v208_v40 = vld [vmem:[%s4188_s1 + $0x4b8] sm:$0xff] }
  0x38   :  { %2021 = vmatprep.subr.mxu1 %v175_v41  ;;  %1987 = vmatpush3.msra.mxu0 %v127_v42  ;;  %v226_v35 = vld [vmem:[%s4188_s1 + $0x548] sm:$0xff]  ;;  %v241_v37 = vld [vmem:[%s4188_s1 + $0x5c0] sm:$0xff]  ;;  %v240_v41 = vld [vmem:[%s4188_s1 + $0x5b8] sm:$0xff] }
  0x39   :  { %2022 = vmatpush3.msra.mxu1 %v159_v43  ;;  %1988 = vmatprep.subr.mxu0 %v142_v44  ;;  %v193_v38 = vld [vmem:[%s4188_s1 + $0x440] sm:$0xff]  ;;  %v192_v42 = vld [vmem:[%s4188_s1 + $0x438] sm:$0xff]  ;;  %v207_v44 = vld [vmem:[%s4188_s1 + $0x4b0] sm:$0xff] }
  0x3a   :  { %2023 = vmatprep.subr.mxu1 %v174_v45  ;;  %1989 = vmatpush3.msra.mxu0 %v126_v46  ;;  %v225_v39 = vld [vmem:[%s4188_s1 + $0x540] sm:$0xff]  ;;  %v224_v43 = vld [vmem:[%s4188_s1 + $0x538] sm:$0xff]  ;;  %v239_v45 = vld [vmem:[%s4188_s1 + $0x5b0] sm:$0xff] }
  0x3b   :  { %2024 = vmatpush3.msra.mxu1 %v158_v47  ;;  %1990 = vmatprep.subr.mxu0 %v141_v48  ;;  %v191_v46 = vld [vmem:[%s4188_s1 + $0x430] sm:$0xff]  ;;  %v206_v48 = vld [vmem:[%s4188_s1 + $0x4a8] sm:$0xff] }
  0x3c   :  { %2025 = vmatprep.subr.mxu1 %v173_v49  ;;  %1991 = vmatpush3.msra.mxu0 %v125_v50  ;;  %v223_v47 = vld [vmem:[%s4188_s1 + $0x530] sm:$0xff]  ;;  %v238_v49 = vld [vmem:[%s4188_s1 + $0x5a8] sm:$0xff] }
  0x3d   :  { %2026 = vmatpush3.msra.mxu1 %v157_v51  ;;  %1992 = vmatprep.subr.mxu0 %v140_v52  ;;  %v190_v50 = vld [vmem:[%s4188_s1 + $0x428] sm:$0xff]  ;;  %v205_v52 = vld [vmem:[%s4188_s1 + $0x4a0] sm:$0xff] }
  0x3e   :  { %2027 = vmatprep.subr.mxu1 %v172_v53  ;;  %1993 = vmatpush3.msra.mxu0 %v124_v54  ;;  %v222_v51 = vld [vmem:[%s4188_s1 + $0x528] sm:$0xff]  ;;  %v237_v53 = vld [vmem:[%s4188_s1 + $0x5a0] sm:$0xff] }
  0x3f   :  { %2028 = vmatpush3.msra.mxu1 %v156_v55  ;;  %1994 = vmatprep.subr.mxu0 %v139_v56  ;;  %v189_v54 = vld [vmem:[%s4188_s1 + $0x420] sm:$0xff]  ;;  %v204_v56 = vld [vmem:[%s4188_s1 + $0x498] sm:$0xff] }
  0x40   :  { %2029 = vmatprep.subr.mxu1 %v171_v57  ;;  %1995 = vmatpush3.msra.mxu0 %v123_v58  ;;  %v221_v55 = vld [vmem:[%s4188_s1 + $0x520] sm:$0xff]  ;;  %v236_v57 = vld [vmem:[%s4188_s1 + $0x598] sm:$0xff] }
  0x41   :  { %2030 = vmatpush3.msra.mxu1 %v155_v59  ;;  %1996 = vmatprep.subr.mxu0 %v138_v60  ;;  %v188_v58 = vld [vmem:[%s4188_s1 + $0x418] sm:$0xff]  ;;  %v203_v60 = vld [vmem:[%s4188_s1 + $0x490] sm:$0xff] }
  0x42   :  { %2031 = vmatprep.subr.mxu1 %v170_v61  ;;  %1997 = vmatpush3.msra.mxu0 %v122_v62  ;;  %v220_v59 = vld [vmem:[%s4188_s1 + $0x518] sm:$0xff]  ;;  %v235_v61 = vld [vmem:[%s4188_s1 + $0x590] sm:$0xff] }
  0x43   :  { %2032 = vmatpush3.msra.mxu1 %v154_v63  ;;  %1998 = vmatprep.subr.mxu0 %v137_v0  ;;  %v187_v62 = vld [vmem:[%s4188_s1 + $0x410] sm:$0xff]  ;;  %v202_v0 = vld [vmem:[%s4188_s1 + $0x488] sm:$0xff] }
  0x44   :  { %2033 = vmatprep.subr.mxu1 %v169_v1  ;;  %1999 = vmatpush3.msra.mxu0 %v121_v2  ;;  %v219_v63 = vld [vmem:[%s4188_s1 + $0x510] sm:$0xff]  ;;  %v234_v1 = vld [vmem:[%s4188_s1 + $0x588] sm:$0xff] }
  0x45   :  { %780 = vmatprep.mubr.f32.mxu0 %v30_v3  ;;  %2034 = vmatpush3.msra.mxu1 %v153_v4  ;;  %v186_v2 = vld [vmem:[%s4188_s1 + $0x408] sm:$0xff]  ;;  %v201_v4 = vld [vmem:[%s4188_s1 + $0x480] sm:$0xff] }
  0x46   :  { %781 = vmatmul.mubr.f32.vlgmr.msra.gmra.mxu0 %v29_v5  ;;  %850 = vmatprep.mubr.f32.mxu1 %v32_v6  ;;  %v218_v3 = vld [vmem:[%s4188_s1 + $0x508] sm:$0xff]  ;;  %v233_v5 = vld [vmem:[%s4188_s1 + $0x580] sm:$0xff] }
  0x47   :  { %2038 = vmatprep.subr.mxu0 %v216_v7  ;;  %2073 = vmatprep.subr.mxu1 %v248_v8  ;;  %v185_v6 = vld [vmem:[%s4188_s1 + $0x400] sm:$0xff]  ;;  %v34_v7 = vld [vmem:[%s4187_s0 + $0x48] sm:$0xff] }
  0x48   :  { %851 = vmatmul.mubr.f32.vlgmr.msra.gmra.mxu1 %v31_v9  ;;  %2039 = vmatpush3.msra.mxu0 %v200_v10  ;;  %v217_v8 = vld [vmem:[%s4188_s1 + $0x500] sm:$0xff]  ;;  %v36_v10 = vld [vmem:[%s4187_s0 + $0x58] sm:$0xff] }
  0x49   :  { %2074 = vmatpush3.msra.mxu1 %v232_v11  ;;  %2040 = vmatprep.subr.mxu0 %v215_v12  ;;  %v33_v9 = vld [vmem:[%s4187_s0 + $0x40] sm:$0xff]  ;;  %v280_v11 = vld [vmem:[%s4188_s1 + $0x6f8] sm:$0xff] }
  0x4a   :  { %2075 = vmatprep.subr.mxu1 %v247_v13  ;;  %2041 = vmatpush3.msra.mxu0 %v199_v14  ;;  %v312_v12 = vld [vmem:[%s4188_s1 + $0x7f8] sm:$0xff]  ;;  %v35_v13 = vld [vmem:[%s4187_s0 + $0x50] sm:$0xff] }
  0x4b   :  { %2076 = vmatpush3.msra.mxu1 %v231_v15  ;;  %2042 = vmatprep.subr.mxu0 %v214_v16  ;;  %v264_v14 = vld [vmem:[%s4188_s1 + $0x678] sm:$0xff]  ;;  %v279_v16 = vld [vmem:[%s4188_s1 + $0x6f0] sm:$0xff] }
  0x4c   :  { %2077 = vmatprep.subr.mxu1 %v246_v17  ;;  %2043 = vmatpush3.msra.mxu0 %v198_v18  ;;  %v296_v15 = vld [vmem:[%s4188_s1 + $0x778] sm:$0xff]  ;;  %v311_v17 = vld [vmem:[%s4188_s1 + $0x7f0] sm:$0xff] }
  0x4d   :  { %2078 = vmatpush3.msra.mxu1 %v230_v19  ;;  %2044 = vmatprep.subr.mxu0 %v213_v20  ;;  %v263_v18 = vld [vmem:[%s4188_s1 + $0x670] sm:$0xff]  ;;  %v278_v20 = vld [vmem:[%s4188_s1 + $0x6e8] sm:$0xff] }
  0x4e   :  { %2079 = vmatprep.subr.mxu1 %v245_v21  ;;  %2045 = vmatpush3.msra.mxu0 %v197_v22  ;;  %v295_v19 = vld [vmem:[%s4188_s1 + $0x770] sm:$0xff]  ;;  %v310_v21 = vld [vmem:[%s4188_s1 + $0x7e8] sm:$0xff] }
  0x4f   :  { %2080 = vmatpush3.msra.mxu1 %v229_v23  ;;  %2046 = vmatprep.subr.mxu0 %v212_v24  ;;  %v262_v22 = vld [vmem:[%s4188_s1 + $0x668] sm:$0xff]  ;;  %v277_v24 = vld [vmem:[%s4188_s1 + $0x6e0] sm:$0xff] }
  0x50   :  { %2081 = vmatprep.subr.mxu1 %v244_v25  ;;  %2047 = vmatpush3.msra.mxu0 %v196_v26  ;;  %v294_v23 = vld [vmem:[%s4188_s1 + $0x768] sm:$0xff]  ;;  %v309_v25 = vld [vmem:[%s4188_s1 + $0x7e0] sm:$0xff] }
  0x51   :  { %2082 = vmatpush3.msra.mxu1 %v228_v27  ;;  %2048 = vmatprep.subr.mxu0 %v211_v28  ;;  %v261_v26 = vld [vmem:[%s4188_s1 + $0x660] sm:$0xff]  ;;  %v276_v28 = vld [vmem:[%s4188_s1 + $0x6d8] sm:$0xff] }
  0x52   :  { %2083 = vmatprep.subr.mxu1 %v243_v29  ;;  %2049 = vmatpush3.msra.mxu0 %v195_v30  ;;  %v293_v27 = vld [vmem:[%s4188_s1 + $0x760] sm:$0xff]  ;;  %v308_v29 = vld [vmem:[%s4188_s1 + $0x7d8] sm:$0xff] }
  0x53   :  { %2084 = vmatpush3.msra.mxu1 %v227_v31  ;;  %2050 = vmatprep.subr.mxu0 %v210_v32  ;;  %v260_v30 = vld [vmem:[%s4188_s1 + $0x658] sm:$0xff]  ;;  %v275_v32 = vld [vmem:[%s4188_s1 + $0x6d0] sm:$0xff] }
  0x54   :  { %2085 = vmatprep.subr.mxu1 %v242_v33  ;;  %2051 = vmatpush3.msra.mxu0 %v194_v34  ;;  %v292_v31 = vld [vmem:[%s4188_s1 + $0x758] sm:$0xff]  ;;  %v307_v33 = vld [vmem:[%s4188_s1 + $0x7d0] sm:$0xff] }
  0x55   :  { %2086 = vmatpush3.msra.mxu1 %v226_v35  ;;  %2052 = vmatprep.subr.mxu0 %v209_v36  ;;  %v259_v34 = vld [vmem:[%s4188_s1 + $0x650] sm:$0xff]  ;;  %v274_v36 = vld [vmem:[%s4188_s1 + $0x6c8] sm:$0xff] }
  0x56   :  { %2087 = vmatprep.subr.mxu1 %v241_v37  ;;  %2053 = vmatpush3.msra.mxu0 %v193_v38  ;;  %v291_v35 = vld [vmem:[%s4188_s1 + $0x750] sm:$0xff]  ;;  %v306_v37 = vld [vmem:[%s4188_s1 + $0x7c8] sm:$0xff] }
  0x57   :  { %2088 = vmatpush3.msra.mxu1 %v225_v39  ;;  %2054 = vmatprep.subr.mxu0 %v208_v40  ;;  %v258_v38 = vld [vmem:[%s4188_s1 + $0x648] sm:$0xff]  ;;  %v273_v40 = vld [vmem:[%s4188_s1 + $0x6c0] sm:$0xff] }
  0x58   :  { %2089 = vmatprep.subr.mxu1 %v240_v41  ;;  %2055 = vmatpush3.msra.mxu0 %v192_v42  ;;  %v290_v39 = vld [vmem:[%s4188_s1 + $0x748] sm:$0xff]  ;;  %v305_v41 = vld [vmem:[%s4188_s1 + $0x7c0] sm:$0xff] }
  0x59   :  { %2090 = vmatpush3.msra.mxu1 %v224_v43  ;;  %2056 = vmatprep.subr.mxu0 %v207_v44  ;;  %v257_v42 = vld [vmem:[%s4188_s1 + $0x640] sm:$0xff]  ;;  %v272_v44 = vld [vmem:[%s4188_s1 + $0x6b8] sm:$0xff] }
  0x5a   :  { %2091 = vmatprep.subr.mxu1 %v239_v45  ;;  %2057 = vmatpush3.msra.mxu0 %v191_v46  ;;  %v289_v43 = vld [vmem:[%s4188_s1 + $0x740] sm:$0xff]  ;;  %v304_v45 = vld [vmem:[%s4188_s1 + $0x7b8] sm:$0xff] }
  0x5b   :  { %2092 = vmatpush3.msra.mxu1 %v223_v47  ;;  %2058 = vmatprep.subr.mxu0 %v206_v48  ;;  %v256_v46 = vld [vmem:[%s4188_s1 + $0x638] sm:$0xff]  ;;  %v271_v48 = vld [vmem:[%s4188_s1 + $0x6b0] sm:$0xff] }
  0x5c   :  { %2093 = vmatprep.subr.mxu1 %v238_v49  ;;  %2059 = vmatpush3.msra.mxu0 %v190_v50  ;;  %v288_v47 = vld [vmem:[%s4188_s1 + $0x738] sm:$0xff]  ;;  %v303_v49 = vld [vmem:[%s4188_s1 + $0x7b0] sm:$0xff] }
  0x5d   :  { %2094 = vmatpush3.msra.mxu1 %v222_v51  ;;  %2060 = vmatprep.subr.mxu0 %v205_v52  ;;  %v255_v50 = vld [vmem:[%s4188_s1 + $0x630] sm:$0xff]  ;;  %v270_v52 = vld [vmem:[%s4188_s1 + $0x6a8] sm:$0xff] }
  0x5e   :  { %2095 = vmatprep.subr.mxu1 %v237_v53  ;;  %2061 = vmatpush3.msra.mxu0 %v189_v54  ;;  %v287_v51 = vld [vmem:[%s4188_s1 + $0x730] sm:$0xff]  ;;  %v302_v53 = vld [vmem:[%s4188_s1 + $0x7a8] sm:$0xff] }
  0x5f   :  { %2096 = vmatpush3.msra.mxu1 %v221_v55  ;;  %2062 = vmatprep.subr.mxu0 %v204_v56  ;;  %v254_v54 = vld [vmem:[%s4188_s1 + $0x628] sm:$0xff]  ;;  %v269_v56 = vld [vmem:[%s4188_s1 + $0x6a0] sm:$0xff] }
  0x60   :  { %2097 = vmatprep.subr.mxu1 %v236_v57  ;;  %2063 = vmatpush3.msra.mxu0 %v188_v58  ;;  %v286_v55 = vld [vmem:[%s4188_s1 + $0x728] sm:$0xff]  ;;  %v301_v57 = vld [vmem:[%s4188_s1 + $0x7a0] sm:$0xff] }
  0x61   :  { %2098 = vmatpush3.msra.mxu1 %v220_v59  ;;  %2064 = vmatprep.subr.mxu0 %v203_v60  ;;  %v253_v58 = vld [vmem:[%s4188_s1 + $0x620] sm:$0xff]  ;;  %v268_v60 = vld [vmem:[%s4188_s1 + $0x698] sm:$0xff] }
  0x62   :  { %2099 = vmatprep.subr.mxu1 %v235_v61  ;;  %2065 = vmatpush3.msra.mxu0 %v187_v62  ;;  %v285_v59 = vld [vmem:[%s4188_s1 + $0x720] sm:$0xff]  ;;  %v300_v61 = vld [vmem:[%s4188_s1 + $0x798] sm:$0xff] }
  0x63   :  { %2100 = vmatpush3.msra.mxu1 %v219_v63  ;;  %2066 = vmatprep.subr.mxu0 %v202_v0  ;;  %v252_v62 = vld [vmem:[%s4188_s1 + $0x618] sm:$0xff]  ;;  %v267_v0 = vld [vmem:[%s4188_s1 + $0x690] sm:$0xff] }
  0x64   :  { %2101 = vmatprep.subr.mxu1 %v234_v1  ;;  %2067 = vmatpush3.msra.mxu0 %v186_v2  ;;  %v284_v63 = vld [vmem:[%s4188_s1 + $0x718] sm:$0xff]  ;;  %v299_v1 = vld [vmem:[%s4188_s1 + $0x790] sm:$0xff] }
  0x65   :  { %2102 = vmatpush3.msra.mxu1 %v218_v3  ;;  %2068 = vmatprep.subr.mxu0 %v201_v4  ;;  %v251_v2 = vld [vmem:[%s4188_s1 + $0x610] sm:$0xff]  ;;  %v266_v4 = vld [vmem:[%s4188_s1 + $0x688] sm:$0xff] }
  0x66   :  { %2103 = vmatprep.subr.mxu1 %v233_v5  ;;  %2069 = vmatpush3.msra.mxu0 %v185_v6  ;;  %v283_v3 = vld [vmem:[%s4188_s1 + $0x710] sm:$0xff]  ;;  %v298_v5 = vld [vmem:[%s4188_s1 + $0x788] sm:$0xff] }
  0x67   :  { %920 = vmatprep.mubr.f32.mxu0 %v34_v7  ;;  %2104 = vmatpush3.msra.mxu1 %v217_v8  ;;  %v250_v6 = vld [vmem:[%s4188_s1 + $0x608] sm:$0xff]  ;;  %v265_v8 = vld [vmem:[%s4188_s1 + $0x680] sm:$0xff] }
  0x68   :  { %921 = vmatmul.mubr.f32.vlgmr.msra.gmra.mxu0 %v33_v9  ;;  %990 = vmatprep.mubr.f32.mxu1 %v36_v10  ;;  %v282_v7 = vld [vmem:[%s4188_s1 + $0x708] sm:$0xff]  ;;  %v297_v9 = vld [vmem:[%s4188_s1 + $0x780] sm:$0xff] }
  0x69   :  { %2108 = vmatprep.subr.mxu0 %v280_v11  ;;  %2143 = vmatprep.subr.mxu1 %v312_v12  ;;  %v249_v10 = vld [vmem:[%s4188_s1 + $0x600] sm:$0xff]  ;;  %v38_v11 = vld [vmem:[%s4187_s0 + $0x68] sm:$0xff] }
  0x6a   :  { %991 = vmatmul.mubr.f32.vlgmr.msra.gmra.mxu1 %v35_v13  ;;  %2109 = vmatpush3.msra.mxu0 %v264_v14  ;;  %v281_v12 = vld [vmem:[%s4188_s1 + $0x700] sm:$0xff]  ;;  %v40_v14 = vld [vmem:[%s4187_s0 + $0x78] sm:$0xff] }
  0x6b   :  { %2144 = vmatpush3.msra.mxu1 %v296_v15  ;;  %2110 = vmatprep.subr.mxu0 %v279_v16  ;;  %v37_v13 = vld [vmem:[%s4187_s0 + $0x60] sm:$0xff]  ;;  %v344_v15 = vld [vmem:[%s4188_s1 + $0x8f8] sm:$0xff] }
  0x6c   :  { %2145 = vmatprep.subr.mxu1 %v311_v17  ;;  %2111 = vmatpush3.msra.mxu0 %v263_v18  ;;  %v376_v16 = vld [vmem:[%s4188_s1 + $0x9f8] sm:$0xff]  ;;  %v39_v17 = vld [vmem:[%s4187_s0 + $0x70] sm:$0xff] }
  0x6d   :  { %2146 = vmatpush3.msra.mxu1 %v295_v19  ;;  %2112 = vmatprep.subr.mxu0 %v278_v20  ;;  %v328_v18 = vld [vmem:[%s4188_s1 + $0x878] sm:$0xff]  ;;  %v343_v20 = vld [vmem:[%s4188_s1 + $0x8f0] sm:$0xff] }
  0x6e   :  { %2147 = vmatprep.subr.mxu1 %v310_v21  ;;  %2113 = vmatpush3.msra.mxu0 %v262_v22  ;;  %v360_v19 = vld [vmem:[%s4188_s1 + $0x978] sm:$0xff]  ;;  %v375_v21 = vld [vmem:[%s4188_s1 + $0x9f0] sm:$0xff] }
  0x6f   :  { %2148 = vmatpush3.msra.mxu1 %v294_v23  ;;  %2114 = vmatprep.subr.mxu0 %v277_v24  ;;  %v327_v22 = vld [vmem:[%s4188_s1 + $0x870] sm:$0xff]  ;;  %v342_v24 = vld [vmem:[%s4188_s1 + $0x8e8] sm:$0xff] }
  0x70   :  { %2149 = vmatprep.subr.mxu1 %v309_v25  ;;  %2115 = vmatpush3.msra.mxu0 %v261_v26  ;;  %v359_v23 = vld [vmem:[%s4188_s1 + $0x970] sm:$0xff]  ;;  %v374_v25 = vld [vmem:[%s4188_s1 + $0x9e8] sm:$0xff] }
  0x71   :  { %2150 = vmatpush3.msra.mxu1 %v293_v27  ;;  %2116 = vmatprep.subr.mxu0 %v276_v28  ;;  %v326_v26 = vld [vmem:[%s4188_s1 + $0x868] sm:$0xff]  ;;  %v341_v28 = vld [vmem:[%s4188_s1 + $0x8e0] sm:$0xff] }
  0x72   :  { %2151 = vmatprep.subr.mxu1 %v308_v29  ;;  %2117 = vmatpush3.msra.mxu0 %v260_v30  ;;  %v358_v27 = vld [vmem:[%s4188_s1 + $0x968] sm:$0xff]  ;;  %v373_v29 = vld [vmem:[%s4188_s1 + $0x9e0] sm:$0xff] }
  0x73   :  { %2152 = vmatpush3.msra.mxu1 %v292_v31  ;;  %2118 = vmatprep.subr.mxu0 %v275_v32  ;;  %v325_v30 = vld [vmem:[%s4188_s1 + $0x860] sm:$0xff]  ;;  %v340_v32 = vld [vmem:[%s4188_s1 + $0x8d8] sm:$0xff] }
  0x74   :  { %2153 = vmatprep.subr.mxu1 %v307_v33  ;;  %2119 = vmatpush3.msra.mxu0 %v259_v34  ;;  %v357_v31 = vld [vmem:[%s4188_s1 + $0x960] sm:$0xff]  ;;  %v372_v33 = vld [vmem:[%s4188_s1 + $0x9d8] sm:$0xff] }
  0x75   :  { %2154 = vmatpush3.msra.mxu1 %v291_v35  ;;  %2120 = vmatprep.subr.mxu0 %v274_v36  ;;  %v324_v34 = vld [vmem:[%s4188_s1 + $0x858] sm:$0xff]  ;;  %v339_v36 = vld [vmem:[%s4188_s1 + $0x8d0] sm:$0xff] }
  0x76   :  { %2155 = vmatprep.subr.mxu1 %v306_v37  ;;  %2121 = vmatpush3.msra.mxu0 %v258_v38  ;;  %v356_v35 = vld [vmem:[%s4188_s1 + $0x958] sm:$0xff]  ;;  %v371_v37 = vld [vmem:[%s4188_s1 + $0x9d0] sm:$0xff] }
  0x77   :  { %2156 = vmatpush3.msra.mxu1 %v290_v39  ;;  %2122 = vmatprep.subr.mxu0 %v273_v40  ;;  %v323_v38 = vld [vmem:[%s4188_s1 + $0x850] sm:$0xff]  ;;  %v338_v40 = vld [vmem:[%s4188_s1 + $0x8c8] sm:$0xff] }
  0x78   :  { %2157 = vmatprep.subr.mxu1 %v305_v41  ;;  %2123 = vmatpush3.msra.mxu0 %v257_v42  ;;  %v355_v39 = vld [vmem:[%s4188_s1 + $0x950] sm:$0xff]  ;;  %v370_v41 = vld [vmem:[%s4188_s1 + $0x9c8] sm:$0xff] }
  0x79   :  { %2158 = vmatpush3.msra.mxu1 %v289_v43  ;;  %2124 = vmatprep.subr.mxu0 %v272_v44  ;;  %v322_v42 = vld [vmem:[%s4188_s1 + $0x848] sm:$0xff]  ;;  %v337_v44 = vld [vmem:[%s4188_s1 + $0x8c0] sm:$0xff] }
  0x7a   :  { %2159 = vmatprep.subr.mxu1 %v304_v45  ;;  %2125 = vmatpush3.msra.mxu0 %v256_v46  ;;  %v354_v43 = vld [vmem:[%s4188_s1 + $0x948] sm:$0xff]  ;;  %v369_v45 = vld [vmem:[%s4188_s1 + $0x9c0] sm:$0xff] }
  0x7b   :  { %2160 = vmatpush3.msra.mxu1 %v288_v47  ;;  %2126 = vmatprep.subr.mxu0 %v271_v48  ;;  %v321_v46 = vld [vmem:[%s4188_s1 + $0x840] sm:$0xff]  ;;  %v336_v48 = vld [vmem:[%s4188_s1 + $0x8b8] sm:$0xff] }
  0x7c   :  { %2161 = vmatprep.subr.mxu1 %v303_v49  ;;  %2127 = vmatpush3.msra.mxu0 %v255_v50  ;;  %v353_v47 = vld [vmem:[%s4188_s1 + $0x940] sm:$0xff]  ;;  %v368_v49 = vld [vmem:[%s4188_s1 + $0x9b8] sm:$0xff] }
  0x7d   :  { %2162 = vmatpush3.msra.mxu1 %v287_v51  ;;  %2128 = vmatprep.subr.mxu0 %v270_v52  ;;  %v320_v50 = vld [vmem:[%s4188_s1 + $0x838] sm:$0xff]  ;;  %v335_v52 = vld [vmem:[%s4188_s1 + $0x8b0] sm:$0xff] }
  0x7e   :  { %2163 = vmatprep.subr.mxu1 %v302_v53  ;;  %2129 = vmatpush3.msra.mxu0 %v254_v54  ;;  %v352_v51 = vld [vmem:[%s4188_s1 + $0x938] sm:$0xff]  ;;  %v367_v53 = vld [vmem:[%s4188_s1 + $0x9b0] sm:$0xff] }
  0x7f   :  { %2164 = vmatpush3.msra.mxu1 %v286_v55  ;;  %2130 = vmatprep.subr.mxu0 %v269_v56  ;;  %v319_v54 = vld [vmem:[%s4188_s1 + $0x830] sm:$0xff]  ;;  %v334_v56 = vld [vmem:[%s4188_s1 + $0x8a8] sm:$0xff] }
  0x80   :  { %2165 = vmatprep.subr.mxu1 %v301_v57  ;;  %2131 = vmatpush3.msra.mxu0 %v253_v58  ;;  %v351_v55 = vld [vmem:[%s4188_s1 + $0x930] sm:$0xff]  ;;  %v366_v57 = vld [vmem:[%s4188_s1 + $0x9a8] sm:$0xff] }
  0x81   :  { %2166 = vmatpush3.msra.mxu1 %v285_v59  ;;  %2132 = vmatprep.subr.mxu0 %v268_v60  ;;  %v318_v58 = vld [vmem:[%s4188_s1 + $0x828] sm:$0xff]  ;;  %v333_v60 = vld [vmem:[%s4188_s1 + $0x8a0] sm:$0xff] }
  0x82   :  { %2167 = vmatprep.subr.mxu1 %v300_v61  ;;  %2133 = vmatpush3.msra.mxu0 %v252_v62  ;;  %v350_v59 = vld [vmem:[%s4188_s1 + $0x928] sm:$0xff]  ;;  %v365_v61 = vld [vmem:[%s4188_s1 + $0x9a0] sm:$0xff] }
  0x83   :  { %2168 = vmatpush3.msra.mxu1 %v284_v63  ;;  %2134 = vmatprep.subr.mxu0 %v267_v0  ;;  %v317_v62 = vld [vmem:[%s4188_s1 + $0x820] sm:$0xff]  ;;  %v332_v0 = vld [vmem:[%s4188_s1 + $0x898] sm:$0xff] }
  0x84   :  { %2169 = vmatprep.subr.mxu1 %v299_v1  ;;  %2135 = vmatpush3.msra.mxu0 %v251_v2  ;;  %v349_v63 = vld [vmem:[%s4188_s1 + $0x920] sm:$0xff]  ;;  %v364_v1 = vld [vmem:[%s4188_s1 + $0x998] sm:$0xff] }
  0x85   :  { %2170 = vmatpush3.msra.mxu1 %v283_v3  ;;  %2136 = vmatprep.subr.mxu0 %v266_v4  ;;  %v316_v2 = vld [vmem:[%s4188_s1 + $0x818] sm:$0xff]  ;;  %v331_v4 = vld [vmem:[%s4188_s1 + $0x890] sm:$0xff] }
  0x86   :  { %2171 = vmatprep.subr.mxu1 %v298_v5  ;;  %2137 = vmatpush3.msra.mxu0 %v250_v6  ;;  %v348_v3 = vld [vmem:[%s4188_s1 + $0x918] sm:$0xff]  ;;  %v363_v5 = vld [vmem:[%s4188_s1 + $0x990] sm:$0xff] }
  0x87   :  { %2172 = vmatpush3.msra.mxu1 %v282_v7  ;;  %2138 = vmatprep.subr.mxu0 %v265_v8  ;;  %v315_v6 = vld [vmem:[%s4188_s1 + $0x810] sm:$0xff]  ;;  %v330_v8 = vld [vmem:[%s4188_s1 + $0x888] sm:$0xff] }
  0x88   :  { %2173 = vmatprep.subr.mxu1 %v297_v9  ;;  %2139 = vmatpush3.msra.mxu0 %v249_v10  ;;  %v347_v7 = vld [vmem:[%s4188_s1 + $0x910] sm:$0xff]  ;;  %v362_v9 = vld [vmem:[%s4188_s1 + $0x988] sm:$0xff] }
  0x89   :  { %1060 = vmatprep.mubr.f32.mxu0 %v38_v11  ;;  %2174 = vmatpush3.msra.mxu1 %v281_v12  ;;  %v314_v10 = vld [vmem:[%s4188_s1 + $0x808] sm:$0xff]  ;;  %v329_v12 = vld [vmem:[%s4188_s1 + $0x880] sm:$0xff] }
  0x8a   :  { %1061 = vmatmul.mubr.f32.vlgmr.msra.gmra.mxu0 %v37_v13  ;;  %1130 = vmatprep.mubr.f32.mxu1 %v40_v14  ;;  %v346_v11 = vld [vmem:[%s4188_s1 + $0x908] sm:$0xff]  ;;  %v361_v13 = vld [vmem:[%s4188_s1 + $0x980] sm:$0xff] }
  0x8b   :  { %2178 = vmatprep.subr.mxu0 %v344_v15  ;;  %2213 = vmatprep.subr.mxu1 %v376_v16  ;;  %v313_v14 = vld [vmem:[%s4188_s1 + $0x800] sm:$0xff]  ;;  %v42_v15 = vld [vmem:[%s4187_s0 + $0x88] sm:$0xff] }
  0x8c   :  { %1131 = vmatmul.mubr.f32.vlgmr.msra.gmra.mxu1 %v39_v17  ;;  %2179 = vmatpush3.msra.mxu0 %v328_v18  ;;  %v345_v16 = vld [vmem:[%s4188_s1 + $0x900] sm:$0xff]  ;;  %v44_v18 = vld [vmem:[%s4187_s0 + $0x98] sm:$0xff] }
  0x8d   :  { %2214 = vmatpush3.msra.mxu1 %v360_v19  ;;  %2180 = vmatprep.subr.mxu0 %v343_v20  ;;  %v41_v17 = vld [vmem:[%s4187_s0 + $0x80] sm:$0xff]  ;;  %v408_v19 = vld [vmem:[%s4188_s1 + $0xaf8] sm:$0xff] }
  0x8e   :  { %2215 = vmatprep.subr.mxu1 %v375_v21  ;;  %2181 = vmatpush3.msra.mxu0 %v327_v22  ;;  %v440_v20 = vld [vmem:[%s4188_s1 + $0xbf8] sm:$0xff]  ;;  %v43_v21 = vld [vmem:[%s4187_s0 + $0x90] sm:$0xff] }
  0x8f   :  { %2216 = vmatpush3.msra.mxu1 %v359_v23  ;;  %2182 = vmatprep.subr.mxu0 %v342_v24  ;;  %v392_v22 = vld [vmem:[%s4188_s1 + $0xa78] sm:$0xff]  ;;  %v407_v24 = vld [vmem:[%s4188_s1 + $0xaf0] sm:$0xff] }
  0x90   :  { %2217 = vmatprep.subr.mxu1 %v374_v25  ;;  %2183 = vmatpush3.msra.mxu0 %v326_v26  ;;  %v424_v23 = vld [vmem:[%s4188_s1 + $0xb78] sm:$0xff]  ;;  %v439_v25 = vld [vmem:[%s4188_s1 + $0xbf0] sm:$0xff] }
  0x91   :  { %2218 = vmatpush3.msra.mxu1 %v358_v27  ;;  %2184 = vmatprep.subr.mxu0 %v341_v28  ;;  %v391_v26 = vld [vmem:[%s4188_s1 + $0xa70] sm:$0xff]  ;;  %v406_v28 = vld [vmem:[%s4188_s1 + $0xae8] sm:$0xff] }
  0x92   :  { %2219 = vmatprep.subr.mxu1 %v373_v29  ;;  %2185 = vmatpush3.msra.mxu0 %v325_v30  ;;  %v423_v27 = vld [vmem:[%s4188_s1 + $0xb70] sm:$0xff]  ;;  %v438_v29 = vld [vmem:[%s4188_s1 + $0xbe8] sm:$0xff] }
  0x93   :  { %2220 = vmatpush3.msra.mxu1 %v357_v31  ;;  %2186 = vmatprep.subr.mxu0 %v340_v32  ;;  %v390_v30 = vld [vmem:[%s4188_s1 + $0xa68] sm:$0xff]  ;;  %v405_v32 = vld [vmem:[%s4188_s1 + $0xae0] sm:$0xff] }
  0x94   :  { %2221 = vmatprep.subr.mxu1 %v372_v33  ;;  %2187 = vmatpush3.msra.mxu0 %v324_v34  ;;  %v422_v31 = vld [vmem:[%s4188_s1 + $0xb68] sm:$0xff]  ;;  %v437_v33 = vld [vmem:[%s4188_s1 + $0xbe0] sm:$0xff] }
  0x95   :  { %2222 = vmatpush3.msra.mxu1 %v356_v35  ;;  %2188 = vmatprep.subr.mxu0 %v339_v36  ;;  %v389_v34 = vld [vmem:[%s4188_s1 + $0xa60] sm:$0xff]  ;;  %v404_v36 = vld [vmem:[%s4188_s1 + $0xad8] sm:$0xff] }
  0x96   :  { %2223 = vmatprep.subr.mxu1 %v371_v37  ;;  %2189 = vmatpush3.msra.mxu0 %v323_v38  ;;  %v421_v35 = vld [vmem:[%s4188_s1 + $0xb60] sm:$0xff]  ;;  %v436_v37 = vld [vmem:[%s4188_s1 + $0xbd8] sm:$0xff] }
  0x97   :  { %2224 = vmatpush3.msra.mxu1 %v355_v39  ;;  %2190 = vmatprep.subr.mxu0 %v338_v40  ;;  %v388_v38 = vld [vmem:[%s4188_s1 + $0xa58] sm:$0xff]  ;;  %v403_v40 = vld [vmem:[%s4188_s1 + $0xad0] sm:$0xff] }
  0x98   :  { %2225 = vmatprep.subr.mxu1 %v370_v41  ;;  %2191 = vmatpush3.msra.mxu0 %v322_v42  ;;  %v420_v39 = vld [vmem:[%s4188_s1 + $0xb58] sm:$0xff]  ;;  %v435_v41 = vld [vmem:[%s4188_s1 + $0xbd0] sm:$0xff] }
  0x99   :  { %2226 = vmatpush3.msra.mxu1 %v354_v43  ;;  %2192 = vmatprep.subr.mxu0 %v337_v44  ;;  %v387_v42 = vld [vmem:[%s4188_s1 + $0xa50] sm:$0xff]  ;;  %v402_v44 = vld [vmem:[%s4188_s1 + $0xac8] sm:$0xff] }
  0x9a   :  { %2227 = vmatprep.subr.mxu1 %v369_v45  ;;  %2193 = vmatpush3.msra.mxu0 %v321_v46  ;;  %v419_v43 = vld [vmem:[%s4188_s1 + $0xb50] sm:$0xff]  ;;  %v434_v45 = vld [vmem:[%s4188_s1 + $0xbc8] sm:$0xff] }
  0x9b   :  { %2228 = vmatpush3.msra.mxu1 %v353_v47  ;;  %2194 = vmatprep.subr.mxu0 %v336_v48  ;;  %v386_v46 = vld [vmem:[%s4188_s1 + $0xa48] sm:$0xff] }
  0x9c   :  { %2229 = vmatprep.subr.mxu1 %v368_v49  ;;  %2195 = vmatpush3.msra.mxu0 %v320_v50  ;;  %v418_v47 = vld [vmem:[%s4188_s1 + $0xb48] sm:$0xff] }
  0x9d   :  { %2230 = vmatpush3.msra.mxu1 %v352_v51  ;;  %2196 = vmatprep.subr.mxu0 %v335_v52 }
  0x9e   :  { %2231 = vmatprep.subr.mxu1 %v367_v53  ;;  %2197 = vmatpush3.msra.mxu0 %v319_v54 }
  0x9f   :  { %2232 = vmatpush3.msra.mxu1 %v351_v55  ;;  %2198 = vmatprep.subr.mxu0 %v334_v56 }
  0xa0   :  { %2233 = vmatprep.subr.mxu1 %v366_v57  ;;  %2199 = vmatpush3.msra.mxu0 %v318_v58 }
  0xa1   :  { %2234 = vmatpush3.msra.mxu1 %v350_v59  ;;  %2200 = vmatprep.subr.mxu0 %v333_v60 }
  0xa2   :  { %2235 = vmatprep.subr.mxu1 %v365_v61  ;;  %2201 = vmatpush3.msra.mxu0 %v317_v62 }
  0xa3   :  { %2236 = vmatpush3.msra.mxu1 %v349_v63  ;;  %2202 = vmatprep.subr.mxu0 %v332_v0 }
  0xa4   :  { %2237 = vmatprep.subr.mxu1 %v364_v1  ;;  %2203 = vmatpush3.msra.mxu0 %v316_v2 }
  0xa5   :  { %2238 = vmatpush3.msra.mxu1 %v348_v3  ;;  %2204 = vmatprep.subr.mxu0 %v331_v4 }
  0xa6   :  { %2239 = vmatprep.subr.mxu1 %v363_v5  ;;  %2205 = vmatpush3.msra.mxu0 %v315_v6 }
  0xa7   :  { %2240 = vmatpush3.msra.mxu1 %v347_v7  ;;  %2206 = vmatprep.subr.mxu0 %v330_v8 }
  0xa8   :  { %2241 = vmatprep.subr.mxu1 %v362_v9  ;;  %2207 = vmatpush3.msra.mxu0 %v314_v10 }
  0xa9   :  { %2242 = vmatpush3.msra.mxu1 %v346_v11  ;;  %2208 = vmatprep.subr.mxu0 %v329_v12 }
  0xaa   :  { %2243 = vmatprep.subr.mxu1 %v361_v13  ;;  %2209 = vmatpush3.msra.mxu0 %v313_v14 }
  0xab   :  { %1200 = vmatprep.mubr.f32.mxu0 %v42_v15  ;;  %2244 = vmatpush3.msra.mxu1 %v345_v16 }
  0xac   :  { %1201 = vmatmul.mubr.f32.vlgmr.msra.gmra.mxu0 %v41_v17  ;;  %1270 = vmatprep.mubr.f32.mxu1 %v44_v18 }
  0xad   :  { %2248 = vmatprep.subr.mxu0 %v408_v19  ;;  %2283 = vmatprep.subr.mxu1 %v440_v20 }
  0xae   :  { %1271 = vmatmul.mubr.f32.vlgmr.msra.gmra.mxu1 %v43_v21  ;;  %2249 = vmatpush3.msra.mxu0 %v392_v22 }
  0xaf   :  { %2284 = vmatpush3.msra.mxu1 %v424_v23  ;;  %2250 = vmatprep.subr.mxu0 %v407_v24 }
  0xb0   :  { %2285 = vmatprep.subr.mxu1 %v439_v25  ;;  %2251 = vmatpush3.msra.mxu0 %v391_v26 }
  0xb1   :  { %2286 = vmatpush3.msra.mxu1 %v423_v27  ;;  %2252 = vmatprep.subr.mxu0 %v406_v28 }
  0xb2   :  { %2287 = vmatprep.subr.mxu1 %v438_v29  ;;  %2253 = vmatpush3.msra.mxu0 %v390_v30 }
  0xb3   :  { %2288 = vmatpush3.msra.mxu1 %v422_v31  ;;  %2254 = vmatprep.subr.mxu0 %v405_v32 }
  0xb4   :  { %2289 = vmatprep.subr.mxu1 %v437_v33  ;;  %2255 = vmatpush3.msra.mxu0 %v389_v34 }
  0xb5   :  { %2290 = vmatpush3.msra.mxu1 %v421_v35  ;;  %2256 = vmatprep.subr.mxu0 %v404_v36 }
  0xb6   :  { %2291 = vmatprep.subr.mxu1 %v436_v37  ;;  %2257 = vmatpush3.msra.mxu0 %v388_v38 }
  0xb7   :  { %2292 = vmatpush3.msra.mxu1 %v420_v39  ;;  %2258 = vmatprep.subr.mxu0 %v403_v40 }
  0xb8   :  { %2293 = vmatprep.subr.mxu1 %v435_v41 }
  0xb9   :  { %12 = vsyncpa [#allocation4], 0  ;;  %2259 = vmatpush3.msra.mxu0 %v387_v42  ;;  %2294 = vmatpush3.msra.mxu1 %v419_v43  ;;  %v401_v48 = vld [vmem:[%s4188_s1 + $0xac0] sm:$0xff]  ;;  %v400_v52 = vld [vmem:[%s4188_s1 + $0xab8] sm:$0xff]  ;;  %vm1731_vm1 = vcmask 130048  }
  0xba   :  { %v433_v49 = vld [vmem:[%s4188_s1 + $0xbc0] sm:$0xff]  ;;  %2260 = vmatprep.subr.mxu0 %v402_v44  ;;  %2295 = vmatprep.subr.mxu1 %v434_v45  ;;  %v432_v53 = vld [vmem:[%s4188_s1 + $0xbb8] sm:$0xff]  ;;  %v399_v56 = vld [vmem:[%s4188_s1 + $0xab0] sm:$0xff] }
  0xbb   :  { %v385_v50 = vld [vmem:[%s4188_s1 + $0xa40] sm:$0xff]  ;;  %2261 = vmatpush3.msra.mxu0 %v386_v46  ;;  %2296 = vmatpush3.msra.mxu1 %v418_v47  ;;  %v384_v54 = vld [vmem:[%s4188_s1 + $0xa38] sm:$0xff]  ;;  %v431_v57 = vld [vmem:[%s4188_s1 + $0xbb0] sm:$0xff] }
  0xbc   :  { %v417_v51 = vld [vmem:[%s4188_s1 + $0xb40] sm:$0xff]  ;;  %2262 = vmatprep.subr.mxu0 %v401_v48  ;;  %2297 = vmatprep.subr.mxu1 %v433_v49  ;;  %v416_v55 = vld [vmem:[%s4188_s1 + $0xb38] sm:$0xff]  ;;  %v383_v58 = vld [vmem:[%s4188_s1 + $0xa30] sm:$0xff] }
  0xbd   :  { %2263 = vmatpush3.msra.mxu0 %v385_v50  ;;  %2298 = vmatpush3.msra.mxu1 %v417_v51  ;;  %v415_v59 = vld [vmem:[%s4188_s1 + $0xb30] sm:$0xff]  ;;  %v398_v60 = vld [vmem:[%s4188_s1 + $0xaa8] sm:$0xff]  ;;  %v397_v0 = vld [vmem:[%s4188_s1 + $0xaa0] sm:$0xff] }
  0xbe   :  { %2264 = vmatprep.subr.mxu0 %v400_v52  ;;  %2299 = vmatprep.subr.mxu1 %v432_v53  ;;  %v430_v61 = vld [vmem:[%s4188_s1 + $0xba8] sm:$0xff]  ;;  %v429_v1 = vld [vmem:[%s4188_s1 + $0xba0] sm:$0xff]  ;;  %v396_v4 = vld [vmem:[%s4188_s1 + $0xa98] sm:$0xff] }
  0xbf   :  { %2265 = vmatpush3.msra.mxu0 %v384_v54  ;;  %2300 = vmatpush3.msra.mxu1 %v416_v55  ;;  %v382_v62 = vld [vmem:[%s4188_s1 + $0xa28] sm:$0xff]  ;;  %v381_v2 = vld [vmem:[%s4188_s1 + $0xa20] sm:$0xff]  ;;  %v428_v5 = vld [vmem:[%s4188_s1 + $0xb98] sm:$0xff] }
  0xc0   :  { %2266 = vmatprep.subr.mxu0 %v399_v56  ;;  %2301 = vmatprep.subr.mxu1 %v431_v57  ;;  %v414_v63 = vld [vmem:[%s4188_s1 + $0xb28] sm:$0xff]  ;;  %v413_v3 = vld [vmem:[%s4188_s1 + $0xb20] sm:$0xff]  ;;  %v380_v6 = vld [vmem:[%s4188_s1 + $0xa18] sm:$0xff] }
  0xc1   :  { %2267 = vmatpush3.msra.mxu0 %v383_v58  ;;  %2302 = vmatpush3.msra.mxu1 %v415_v59  ;;  %v412_v7 = vld [vmem:[%s4188_s1 + $0xb18] sm:$0xff]  ;;  %v395_v8 = vld [vmem:[%s4188_s1 + $0xa90] sm:$0xff]  ;;  %v394_v12 = vld [vmem:[%s4188_s1 + $0xa88] sm:$0xff] }
  0xc2   :  { %2268 = vmatprep.subr.mxu0 %v398_v60  ;;  %2303 = vmatprep.subr.mxu1 %v430_v61  ;;  %v427_v9 = vld [vmem:[%s4188_s1 + $0xb90] sm:$0xff]  ;;  %v426_v13 = vld [vmem:[%s4188_s1 + $0xb88] sm:$0xff]  ;;  %v393_v16 = vld [vmem:[%s4188_s1 + $0xa80] sm:$0xff] }
  0xc3   :  { %2269 = vmatpush3.msra.mxu0 %v382_v62  ;;  %2304 = vmatpush3.msra.mxu1 %v414_v63  ;;  %v379_v10 = vld [vmem:[%s4188_s1 + $0xa10] sm:$0xff]  ;;  %v378_v14 = vld [vmem:[%s4188_s1 + $0xa08] sm:$0xff]  ;;  %v425_v17 = vld [vmem:[%s4188_s1 + $0xb80] sm:$0xff] }
  0xc4   :  { %2270 = vmatprep.subr.mxu0 %v397_v0  ;;  %2305 = vmatprep.subr.mxu1 %v429_v1  ;;  %v411_v11 = vld [vmem:[%s4188_s1 + $0xb10] sm:$0xff]  ;;  %v410_v15 = vld [vmem:[%s4188_s1 + $0xb08] sm:$0xff]  ;;  %v377_v18 = vld [vmem:[%s4188_s1 + $0xa00] sm:$0xff] }
  0xc5   :  { %2271 = vmatpush3.msra.mxu0 %v381_v2  ;;  %2306 = vmatpush3.msra.mxu1 %v413_v3  ;;  %v46_v19 = vld [vmem:[%s4187_s0 + $0xa8] sm:$0xff]  ;;  %v409_v20 = vld [vmem:[%s4188_s1 + $0xb00] sm:$0xff]  ;;  %v48_v22 = vld [vmem:[%s4187_s0 + $0xb8] sm:$0xff] }
  0xc6   :  { %2272 = vmatprep.subr.mxu0 %v396_v4  ;;  %2307 = vmatprep.subr.mxu1 %v428_v5  ;;  %v45_v21 = vld [vmem:[%s4187_s0 + $0xa0] sm:$0xff]  ;;  %v472_v23 = vld [vmem:[%s4188_s1 + $0xcf8] sm:$0xff]  ;;  %v47_v25 = vld [vmem:[%s4187_s0 + $0xb0] sm:$0xff] }
  0xc7   :  { %2273 = vmatpush3.msra.mxu0 %v380_v6  ;;  %2308 = vmatpush3.msra.mxu1 %v412_v7  ;;  %v504_v24 = vld [vmem:[%s4188_s1 + $0xdf8] sm:$0xff]  ;;  %v471_v28 = vld [vmem:[%s4188_s1 + $0xcf0] sm:$0xff]  ;;  %v470_v32 = vld [vmem:[%s4188_s1 + $0xce8] sm:$0xff] }
  0xc8   :  { %2274 = vmatprep.subr.mxu0 %v395_v8  ;;  %2309 = vmatprep.subr.mxu1 %v427_v9  ;;  %v456_v26 = vld [vmem:[%s4188_s1 + $0xc78] sm:$0xff]  ;;  %v503_v29 = vld [vmem:[%s4188_s1 + $0xdf0] sm:$0xff]  ;;  %v502_v33 = vld [vmem:[%s4188_s1 + $0xde8] sm:$0xff] }
  0xc9   :  { %2275 = vmatpush3.msra.mxu0 %v379_v10  ;;  %2310 = vmatpush3.msra.mxu1 %v411_v11  ;;  %v488_v27 = vld [vmem:[%s4188_s1 + $0xd78] sm:$0xff]  ;;  %v455_v30 = vld [vmem:[%s4188_s1 + $0xc70] sm:$0xff]  ;;  %v454_v34 = vld [vmem:[%s4188_s1 + $0xc68] sm:$0xff] }
  0xca   :  { %2276 = vmatprep.subr.mxu0 %v394_v12  ;;  %2311 = vmatprep.subr.mxu1 %v426_v13  ;;  %v487_v31 = vld [vmem:[%s4188_s1 + $0xd70] sm:$0xff]  ;;  %v486_v35 = vld [vmem:[%s4188_s1 + $0xd68] sm:$0xff]  ;;  %v469_v36 = vld [vmem:[%s4188_s1 + $0xce0] sm:$0xff] }
  0xcb   :  { %2277 = vmatpush3.msra.mxu0 %v378_v14  ;;  %2312 = vmatpush3.msra.mxu1 %v410_v15  ;;  %v501_v37 = vld [vmem:[%s4188_s1 + $0xde0] sm:$0xff]  ;;  %v468_v40 = vld [vmem:[%s4188_s1 + $0xcd8] sm:$0xff]  ;;  %v467_v44 = vld [vmem:[%s4188_s1 + $0xcd0] sm:$0xff] }
  0xcc   :  { %2278 = vmatprep.subr.mxu0 %v393_v16  ;;  %2313 = vmatprep.subr.mxu1 %v425_v17  ;;  %v453_v38 = vld [vmem:[%s4188_s1 + $0xc60] sm:$0xff]  ;;  %v500_v41 = vld [vmem:[%s4188_s1 + $0xdd8] sm:$0xff]  ;;  %v499_v45 = vld [vmem:[%s4188_s1 + $0xdd0] sm:$0xff] }
  0xcd   :  { %2279 = vmatpush3.msra.mxu0 %v377_v18  ;;  %1340 = vmatprep.mubr.f32.mxu0 %v46_v19  ;;  %v485_v39 = vld [vmem:[%s4188_s1 + $0xd60] sm:$0xff]  ;;  %v452_v42 = vld [vmem:[%s4188_s1 + $0xc58] sm:$0xff]  ;;  %v451_v46 = vld [vmem:[%s4188_s1 + $0xc50] sm:$0xff] }
  0xce   :  { %2314 = vmatpush3.msra.mxu1 %v409_v20  ;;  %1341 = vmatmul.mubr.f32.vlgmr.msra.gmra.mxu0 %v45_v21  ;;  %v484_v43 = vld [vmem:[%s4188_s1 + $0xd58] sm:$0xff]  ;;  %v483_v47 = vld [vmem:[%s4188_s1 + $0xd50] sm:$0xff]  ;;  %v466_v48 = vld [vmem:[%s4188_s1 + $0xcc8] sm:$0xff] }
  0xcf   :  { %1410 = vmatprep.mubr.f32.mxu1 %v48_v22  ;;  %2318 = vmatprep.subr.mxu0 %v472_v23  ;;  %v498_v49 = vld [vmem:[%s4188_s1 + $0xdc8] sm:$0xff]  ;;  %v465_v52 = vld [vmem:[%s4188_s1 + $0xcc0] sm:$0xff]  ;;  %v464_v56 = vld [vmem:[%s4188_s1 + $0xcb8] sm:$0xff] }
  0xd0   :  { %2353 = vmatprep.subr.mxu1 %v504_v24  ;;  %1411 = vmatmul.mubr.f32.vlgmr.msra.gmra.mxu1 %v47_v25  ;;  %v450_v50 = vld [vmem:[%s4188_s1 + $0xc48] sm:$0xff]  ;;  %v497_v53 = vld [vmem:[%s4188_s1 + $0xdc0] sm:$0xff]  ;;  %v496_v57 = vld [vmem:[%s4188_s1 + $0xdb8] sm:$0xff] }
  0xd1   :  { %2319 = vmatpush3.msra.mxu0 %v456_v26  ;;  %2354 = vmatpush3.msra.mxu1 %v488_v27  ;;  %v482_v51 = vld [vmem:[%s4188_s1 + $0xd48] sm:$0xff]  ;;  %v449_v54 = vld [vmem:[%s4188_s1 + $0xc40] sm:$0xff]  ;;  %v448_v58 = vld [vmem:[%s4188_s1 + $0xc38] sm:$0xff] }
  0xd2   :  { %2320 = vmatprep.subr.mxu0 %v471_v28  ;;  %2355 = vmatprep.subr.mxu1 %v503_v29  ;;  %v481_v55 = vld [vmem:[%s4188_s1 + $0xd40] sm:$0xff]  ;;  %v480_v59 = vld [vmem:[%s4188_s1 + $0xd38] sm:$0xff]  ;;  %v463_v60 = vld [vmem:[%s4188_s1 + $0xcb0] sm:$0xff] }
  0xd3   :  { %2321 = vmatpush3.msra.mxu0 %v455_v30  ;;  %2356 = vmatpush3.msra.mxu1 %v487_v31  ;;  %v495_v61 = vld [vmem:[%s4188_s1 + $0xdb0] sm:$0xff]  ;;  %v462_v0 = vld [vmem:[%s4188_s1 + $0xca8] sm:$0xff]  ;;  %v461_v4 = vld [vmem:[%s4188_s1 + $0xca0] sm:$0xff] }
  0xd4   :  { %2322 = vmatprep.subr.mxu0 %v470_v32  ;;  %2357 = vmatprep.subr.mxu1 %v502_v33  ;;  %v447_v62 = vld [vmem:[%s4188_s1 + $0xc30] sm:$0xff]  ;;  %v494_v1 = vld [vmem:[%s4188_s1 + $0xda8] sm:$0xff]  ;;  %v493_v5 = vld [vmem:[%s4188_s1 + $0xda0] sm:$0xff] }
  0xd5   :  { %2323 = vmatpush3.msra.mxu0 %v454_v34  ;;  %2358 = vmatpush3.msra.mxu1 %v486_v35  ;;  %v479_v63 = vld [vmem:[%s4188_s1 + $0xd30] sm:$0xff]  ;;  %v446_v2 = vld [vmem:[%s4188_s1 + $0xc28] sm:$0xff]  ;;  %v445_v6 = vld [vmem:[%s4188_s1 + $0xc20] sm:$0xff] }
  0xd6   :  { %2324 = vmatprep.subr.mxu0 %v469_v36  ;;  %2359 = vmatprep.subr.mxu1 %v501_v37  ;;  %v478_v3 = vld [vmem:[%s4188_s1 + $0xd28] sm:$0xff]  ;;  %v477_v7 = vld [vmem:[%s4188_s1 + $0xd20] sm:$0xff]  ;;  %v460_v8 = vld [vmem:[%s4188_s1 + $0xc98] sm:$0xff] }
  0xd7   :  { %2325 = vmatpush3.msra.mxu0 %v453_v38  ;;  %2360 = vmatpush3.msra.mxu1 %v485_v39  ;;  %v492_v9 = vld [vmem:[%s4188_s1 + $0xd98] sm:$0xff]  ;;  %v459_v12 = vld [vmem:[%s4188_s1 + $0xc90] sm:$0xff]  ;;  %v458_v16 = vld [vmem:[%s4188_s1 + $0xc88] sm:$0xff] }
  0xd8   :  { %2326 = vmatprep.subr.mxu0 %v468_v40  ;;  %2361 = vmatprep.subr.mxu1 %v500_v41  ;;  %v444_v10 = vld [vmem:[%s4188_s1 + $0xc18] sm:$0xff]  ;;  %v491_v13 = vld [vmem:[%s4188_s1 + $0xd90] sm:$0xff]  ;;  %v490_v17 = vld [vmem:[%s4188_s1 + $0xd88] sm:$0xff] }
  0xd9   :  { %2327 = vmatpush3.msra.mxu0 %v452_v42  ;;  %2362 = vmatpush3.msra.mxu1 %v484_v43  ;;  %v476_v11 = vld [vmem:[%s4188_s1 + $0xd18] sm:$0xff]  ;;  %v443_v14 = vld [vmem:[%s4188_s1 + $0xc10] sm:$0xff]  ;;  %v442_v18 = vld [vmem:[%s4188_s1 + $0xc08] sm:$0xff] }
  0xda   :  { %2328 = vmatprep.subr.mxu0 %v467_v44  ;;  %2363 = vmatprep.subr.mxu1 %v499_v45  ;;  %v475_v15 = vld [vmem:[%s4188_s1 + $0xd10] sm:$0xff]  ;;  %v474_v19 = vld [vmem:[%s4188_s1 + $0xd08] sm:$0xff]  ;;  %v457_v20 = vld [vmem:[%s4188_s1 + $0xc80] sm:$0xff] }
  0xdb   :  { %2329 = vmatpush3.msra.mxu0 %v451_v46  ;;  %2364 = vmatpush3.msra.mxu1 %v483_v47  ;;  %v489_v21 = vld [vmem:[%s4188_s1 + $0xd80] sm:$0xff]  ;;  %v50_v23 = vld [vmem:[%s4187_s0 + $0xc8] sm:$0xff]  ;;  %v52_v26 = vld [vmem:[%s4187_s0 + $0xd8] sm:$0xff] }
  0xdc   :  { %2330 = vmatprep.subr.mxu0 %v466_v48  ;;  %2365 = vmatprep.subr.mxu1 %v498_v49  ;;  %v441_v22 = vld [vmem:[%s4188_s1 + $0xc00] sm:$0xff]  ;;  %v536_v27 = vld [vmem:[%s4188_s1 + $0xef8] sm:$0xff]  ;;  %v51_v29 = vld [vmem:[%s4187_s0 + $0xd0] sm:$0xff] }
  0xdd   :  { %2331 = vmatpush3.msra.mxu0 %v450_v50  ;;  %2366 = vmatpush3.msra.mxu1 %v482_v51  ;;  %v473_v24 = vld [vmem:[%s4188_s1 + $0xd00] sm:$0xff]  ;;  %v568_v28 = vld [vmem:[%s4188_s1 + $0xff8] sm:$0xff]  ;;  %v535_v32 = vld [vmem:[%s4188_s1 + $0xef0] sm:$0xff] }
  0xde   :  { %2332 = vmatprep.subr.mxu0 %v465_v52  ;;  %2367 = vmatprep.subr.mxu1 %v497_v53  ;;  %v49_v25 = vld [vmem:[%s4187_s0 + $0xc0] sm:$0xff]  ;;  %v520_v30 = vld [vmem:[%s4188_s1 + $0xe78] sm:$0xff]  ;;  %v567_v33 = vld [vmem:[%s4188_s1 + $0xff0] sm:$0xff] }
  0xdf   :  { %2333 = vmatpush3.msra.mxu0 %v449_v54  ;;  %2368 = vmatpush3.msra.mxu1 %v481_v55  ;;  %v552_v31 = vld [vmem:[%s4188_s1 + $0xf78] sm:$0xff]  ;;  %v519_v34 = vld [vmem:[%s4188_s1 + $0xe70] sm:$0xff]  ;;  %v534_v36 = vld [vmem:[%s4188_s1 + $0xee8] sm:$0xff] }
  0xe0   :  { %2334 = vmatprep.subr.mxu0 %v464_v56  ;;  %2369 = vmatprep.subr.mxu1 %v496_v57  ;;  %v551_v35 = vld [vmem:[%s4188_s1 + $0xf70] sm:$0xff]  ;;  %v566_v37 = vld [vmem:[%s4188_s1 + $0xfe8] sm:$0xff]  ;;  %v533_v40 = vld [vmem:[%s4188_s1 + $0xee0] sm:$0xff] }
  0xe1   :  { %2335 = vmatpush3.msra.mxu0 %v448_v58  ;;  %2370 = vmatpush3.msra.mxu1 %v480_v59  ;;  %v518_v38 = vld [vmem:[%s4188_s1 + $0xe68] sm:$0xff]  ;;  %v565_v41 = vld [vmem:[%s4188_s1 + $0xfe0] sm:$0xff]  ;;  %v532_v44 = vld [vmem:[%s4188_s1 + $0xed8] sm:$0xff] }
  0xe2   :  { %2336 = vmatprep.subr.mxu0 %v463_v60  ;;  %2371 = vmatprep.subr.mxu1 %v495_v61  ;;  %v550_v39 = vld [vmem:[%s4188_s1 + $0xf68] sm:$0xff]  ;;  %v517_v42 = vld [vmem:[%s4188_s1 + $0xe60] sm:$0xff]  ;;  %v564_v45 = vld [vmem:[%s4188_s1 + $0xfd8] sm:$0xff] }
  0xe3   :  { %2337 = vmatpush3.msra.mxu0 %v447_v62  ;;  %2372 = vmatpush3.msra.mxu1 %v479_v63  ;;  %v549_v43 = vld [vmem:[%s4188_s1 + $0xf60] sm:$0xff]  ;;  %v516_v46 = vld [vmem:[%s4188_s1 + $0xe58] sm:$0xff]  ;;  %v531_v48 = vld [vmem:[%s4188_s1 + $0xed0] sm:$0xff] }
  0xe4   :  { %2338 = vmatprep.subr.mxu0 %v462_v0  ;;  %2373 = vmatprep.subr.mxu1 %v494_v1  ;;  %v548_v47 = vld [vmem:[%s4188_s1 + $0xf58] sm:$0xff]  ;;  %v563_v49 = vld [vmem:[%s4188_s1 + $0xfd0] sm:$0xff]  ;;  %v530_v52 = vld [vmem:[%s4188_s1 + $0xec8] sm:$0xff] }
  0xe5   :  { %2339 = vmatpush3.msra.mxu0 %v446_v2  ;;  %2374 = vmatpush3.msra.mxu1 %v478_v3  ;;  %v515_v50 = vld [vmem:[%s4188_s1 + $0xe50] sm:$0xff]  ;;  %v562_v53 = vld [vmem:[%s4188_s1 + $0xfc8] sm:$0xff]  ;;  %v529_v56 = vld [vmem:[%s4188_s1 + $0xec0] sm:$0xff] }
  0xe6   :  { %2340 = vmatprep.subr.mxu0 %v461_v4  ;;  %2375 = vmatprep.subr.mxu1 %v493_v5  ;;  %v547_v51 = vld [vmem:[%s4188_s1 + $0xf50] sm:$0xff]  ;;  %v514_v54 = vld [vmem:[%s4188_s1 + $0xe48] sm:$0xff]  ;;  %v561_v57 = vld [vmem:[%s4188_s1 + $0xfc0] sm:$0xff] }
  0xe7   :  { %2341 = vmatpush3.msra.mxu0 %v445_v6  ;;  %2376 = vmatpush3.msra.mxu1 %v477_v7  ;;  %v546_v55 = vld [vmem:[%s4188_s1 + $0xf48] sm:$0xff]  ;;  %v513_v58 = vld [vmem:[%s4188_s1 + $0xe40] sm:$0xff]  ;;  %v528_v60 = vld [vmem:[%s4188_s1 + $0xeb8] sm:$0xff] }
  0xe8   :  { %2342 = vmatprep.subr.mxu0 %v460_v8  ;;  %2377 = vmatprep.subr.mxu1 %v492_v9  ;;  %v545_v59 = vld [vmem:[%s4188_s1 + $0xf40] sm:$0xff]  ;;  %v560_v61 = vld [vmem:[%s4188_s1 + $0xfb8] sm:$0xff]  ;;  %v527_v0 = vld [vmem:[%s4188_s1 + $0xeb0] sm:$0xff] }
  0xe9   :  { %2343 = vmatpush3.msra.mxu0 %v444_v10  ;;  %2378 = vmatpush3.msra.mxu1 %v476_v11  ;;  %v512_v62 = vld [vmem:[%s4188_s1 + $0xe38] sm:$0xff]  ;;  %v559_v1 = vld [vmem:[%s4188_s1 + $0xfb0] sm:$0xff]  ;;  %v526_v4 = vld [vmem:[%s4188_s1 + $0xea8] sm:$0xff] }
  0xea   :  { %2344 = vmatprep.subr.mxu0 %v459_v12  ;;  %2379 = vmatprep.subr.mxu1 %v491_v13  ;;  %v544_v63 = vld [vmem:[%s4188_s1 + $0xf38] sm:$0xff]  ;;  %v511_v2 = vld [vmem:[%s4188_s1 + $0xe30] sm:$0xff]  ;;  %v558_v5 = vld [vmem:[%s4188_s1 + $0xfa8] sm:$0xff] }
  0xeb   :  { %2345 = vmatpush3.msra.mxu0 %v443_v14  ;;  %2380 = vmatpush3.msra.mxu1 %v475_v15  ;;  %v543_v3 = vld [vmem:[%s4188_s1 + $0xf30] sm:$0xff]  ;;  %v510_v6 = vld [vmem:[%s4188_s1 + $0xe28] sm:$0xff]  ;;  %v525_v8 = vld [vmem:[%s4188_s1 + $0xea0] sm:$0xff] }
  0xec   :  { %2346 = vmatprep.subr.mxu0 %v458_v16  ;;  %2381 = vmatprep.subr.mxu1 %v490_v17  ;;  %v542_v7 = vld [vmem:[%s4188_s1 + $0xf28] sm:$0xff]  ;;  %v557_v9 = vld [vmem:[%s4188_s1 + $0xfa0] sm:$0xff]  ;;  %v524_v12 = vld [vmem:[%s4188_s1 + $0xe98] sm:$0xff] }
  0xed   :  { %2347 = vmatpush3.msra.mxu0 %v442_v18  ;;  %2382 = vmatpush3.msra.mxu1 %v474_v19  ;;  %v509_v10 = vld [vmem:[%s4188_s1 + $0xe20] sm:$0xff]  ;;  %v556_v13 = vld [vmem:[%s4188_s1 + $0xf98] sm:$0xff]  ;;  %v523_v16 = vld [vmem:[%s4188_s1 + $0xe90] sm:$0xff] }
  0xee   :  { %2348 = vmatprep.subr.mxu0 %v457_v20  ;;  %2383 = vmatprep.subr.mxu1 %v489_v21  ;;  %v541_v11 = vld [vmem:[%s4188_s1 + $0xf20] sm:$0xff]  ;;  %v508_v14 = vld [vmem:[%s4188_s1 + $0xe18] sm:$0xff]  ;;  %v555_v17 = vld [vmem:[%s4188_s1 + $0xf90] sm:$0xff] }
  0xef   :  { %2349 = vmatpush3.msra.mxu0 %v441_v22  ;;  %1480 = vmatprep.mubr.f32.mxu0 %v50_v23  ;;  %v540_v15 = vld [vmem:[%s4188_s1 + $0xf18] sm:$0xff]  ;;  %v507_v18 = vld [vmem:[%s4188_s1 + $0xe10] sm:$0xff]  ;;  %v522_v20 = vld [vmem:[%s4188_s1 + $0xe88] sm:$0xff] }
  0xf0   :  { %2384 = vmatpush3.msra.mxu1 %v473_v24  ;;  %1481 = vmatmul.mubr.f32.vlgmr.msra.gmra.mxu0 %v49_v25  ;;  %v539_v19 = vld [vmem:[%s4188_s1 + $0xf10] sm:$0xff]  ;;  %v554_v21 = vld [vmem:[%s4188_s1 + $0xf88] sm:$0xff]  ;;  %v521_v24 = vld [vmem:[%s4188_s1 + $0xe80] sm:$0xff] }
  0xf1   :  { %1550 = vmatprep.mubr.f32.mxu1 %v52_v26  ;;  %2388 = vmatprep.subr.mxu0 %v536_v27  ;;  %v506_v22 = vld [vmem:[%s4188_s1 + $0xe08] sm:$0xff]  ;;  %v553_v25 = vld [vmem:[%s4188_s1 + $0xf80] sm:$0xff] }
  0xf2   :  { %2423 = vmatprep.subr.mxu1 %v568_v28  ;;  %1551 = vmatmul.mubr.f32.vlgmr.msra.gmra.mxu1 %v51_v29  ;;  %v538_v23 = vld [vmem:[%s4188_s1 + $0xf08] sm:$0xff]  ;;  %v505_v26 = vld [vmem:[%s4188_s1 + $0xe00] sm:$0xff]  ;;  %v56_v29 = vld [vmem:[%s4187_s0 + $0xf8] sm:$0xff] }
  0xf3   :  { %2389 = vmatpush3.msra.mxu0 %v520_v30  ;;  %2424 = vmatpush3.msra.mxu1 %v552_v31  ;;  %v54_v27 = vld [vmem:[%s4187_s0 + $0xe8] sm:$0xff]  ;;  %v537_v28 = vld [vmem:[%s4188_s1 + $0xf00] sm:$0xff]  ;;  %v55_v31 = vld [vmem:[%s4187_s0 + $0xf0] sm:$0xff] }
  0xf4   :  { %2390 = vmatprep.subr.mxu0 %v535_v32  ;;  %2425 = vmatprep.subr.mxu1 %v567_v33  ;;  %v53_v30 = vld [vmem:[%s4187_s0 + $0xe0] sm:$0xff]  ;;  %v1706_v32 = vld [vmem:[%s4190_s3 + $0x28] sm:$0xff]  ;;  %v1708_v33 = vld [vmem:[%s4190_s3 + $0x38] sm:$0xff] }
  0xf5   :  { %2391 = vmatpush3.msra.mxu0 %v519_v34  ;;  %2426 = vmatpush3.msra.mxu1 %v551_v35  ;;  %v1705_v34 = vld [vmem:[%s4190_s3 + $0x20] sm:$0xff]  ;;  %v1707_v35 = vld [vmem:[%s4190_s3 + $0x30] sm:$0xff] }
  0xf6   :  { %2392 = vmatprep.subr.mxu0 %v534_v36  ;;  %2427 = vmatprep.subr.mxu1 %v566_v37  ;;  %v1702_v36 = vld [vmem:[%s4190_s3 + $0x8] sm:$0xff]  ;;  %v1704_v37 = vld [vmem:[%s4190_s3 + $0x18] sm:$0xff] }
  0xf7   :  { %2393 = vmatpush3.msra.mxu0 %v518_v38  ;;  %2428 = vmatpush3.msra.mxu1 %v550_v39  ;;  %v1701_v38 = vld [vmem:[%s4190_s3] sm:$0xff]  ;;  %v1703_v39 = vld [vmem:[%s4190_s3 + $0x10] sm:$0xff] }
  0xf8   :  { %2394 = vmatprep.subr.mxu0 %v533_v40  ;;  %2429 = vmatprep.subr.mxu1 %v565_v41  ;;  %v2482_v40 = vmov 0.0   ;;  %v1930_v41 = vpop.f32.mrf.mxu0 }
  0xf9   :  { %2395 = vmatpush3.msra.mxu0 %v517_v42  ;;  %2430 = vmatpush3.msra.mxu1 %v549_v43  ;;  %v1965_v42 = vpop.f32.mrf.mxu1 }
  0xfa   :  { %2396 = vmatprep.subr.mxu0 %v532_v44  ;;  %2431 = vmatprep.subr.mxu1 %v564_v45  ;;  %v1931_v43 = vpop.f32.mrf.mxu0 }
  0xfb   :  { %2397 = vmatpush3.msra.mxu0 %v516_v46  ;;  %2432 = vmatpush3.msra.mxu1 %v548_v47  ;;  %v1932_v45 = vadd.f32 %v1931_v43, %v1930_v41  ;;  %v1895_v46 = vld [vmem:[%s4189_s2] ss:$0 sm:$0xff]  ;;  %v1966_v47 = vpop.f32.mrf.mxu1  ;;  %v1698_v41 = vstv %s4192_s5  ;;  %s2483_s5 = smov [#allocation3]  }
  0xfc   :  { %2398 = vmatprep.subr.mxu0 %v531_v48  ;;  %2433 = vmatprep.subr.mxu1 %v563_v49  ;;  %s1887_s23 = sshll.u32 %s2483_s5, 4  ;;  %s1888_s23 = int_to_ptr.vmem [resolvable:$true] %s1887_s23 }
  0xfd   :  { %2399 = vmatpush3.msra.mxu0 %v515_v50  ;;  %2434 = vmatpush3.msra.mxu1 %v547_v51  ;;  %v643_v50 = vadd.f32 %v1932_v45, %v1895_v46  ;;  %v1967_v51 = vadd.f32 %v1966_v47, %v1965_v42  ;;  %v1711_v45 = vlaneseq  ;;  %p2465_p1 = scmp.lt.s32.totalorder %s1888_s23, %s1888_s23 }
  0xfe   :  { %2400 = vmatprep.subr.mxu0 %v530_v52  ;;  %2435 = vmatprep.subr.mxu1 %v562_v53 }
  0xff   :  { %2401 = vmatpush3.msra.mxu0 %v514_v54  ;;  %2436 = vmatpush3.msra.mxu1 %v546_v55  ;;  %v713_v55 = vadd.f32 %v1967_v51, %v643_v50  ;;  %v1712_v46 = vshrl.u32 %v1711_v45, 7 }
 0x100   :  { %2402 = vmatprep.subr.mxu0 %v529_v56  ;;  %2437 = vmatprep.subr.mxu1 %v561_v57 }
 0x101   :  { %2403 = vmatpush3.msra.mxu0 %v513_v58  ;;  %2438 = vmatpush3.msra.mxu1 %v545_v59  ;;  %v1713_v47 = vsub.s32 0, %v1712_v46  ;;  %v1717_v50 = vsub.s32 1, %v1712_v46  ;;  %v1725_v51 = vsub.s32 3, %v1712_v46 }
 0x102   :  { %2404 = vmatprep.subr.mxu0 %v528_v60  ;;  %2439 = vmatprep.subr.mxu1 %v560_v61 }
 0x103   :  { %2405 = vmatpush3.msra.mxu0 %v512_v62  ;;  %2440 = vmatpush3.msra.mxu1 %v544_v63 }
 0x104   :  { %2406 = vmatprep.subr.mxu0 %v527_v0  ;;  %2441 = vmatprep.subr.mxu1 %v559_v1 }
 0x105   :  { %2407 = vmatpush3.msra.mxu0 %v511_v2  ;;  %2442 = vmatpush3.msra.mxu1 %v543_v3 }
 0x106   :  { %2408 = vmatprep.subr.mxu0 %v526_v4  ;;  %2443 = vmatprep.subr.mxu1 %v558_v5  ;;  %v2000_v44 = vpop.f32.mrf.mxu0 }
 0x107   :  { %2409 = vmatpush3.msra.mxu0 %v510_v6  ;;  %2444 = vmatpush3.msra.mxu1 %v542_v7 }
 0x108   :  { %2410 = vmatprep.subr.mxu0 %v525_v8  ;;  %2445 = vmatprep.subr.mxu1 %v557_v9  ;;  %v2035_v48 = vpop.f32.mrf.mxu1  ;;  %v2001_v49 = vpop.f32.mrf.mxu0 }
 0x109   :  { %2411 = vmatpush3.msra.mxu0 %v509_v10  ;;  %2446 = vmatpush3.msra.mxu1 %v541_v11  ;;  %v2002_v53 = vadd.f32 %v2001_v49, %v2000_v44  ;;  %v1709_v49 = vld [vmem:[%s4191_s4] sm:$0xf]  ;;  %s2460_s4 = scalar_lea.vmem %s1888_s23, 512 }
 0x10a   :  { %2412 = vmatprep.subr.mxu0 %v524_v12  ;;  %2447 = vmatprep.subr.mxu1 %v556_v13  ;;  %v2036_v54 = vpop.f32.mrf.mxu1  ;;  %p2461_p0 = scmp.ne.s32.totalorder %s1888_s23, %s2460_s4  ;;  %p2466_p2 = scmp.lt.s32.totalorder %s2460_s4, %s2460_s4 }
 0x10b   :  { %2413 = vmatpush3.msra.mxu0 %v508_v14  ;;  %2448 = vmatpush3.msra.mxu1 %v540_v15  ;;  %v783_v58 = vadd.f32 %v2002_v53, %v713_v55  ;;  %v2037_v59 = vadd.f32 %v2036_v54, %v2035_v48  ;;  %v1721_v48 = vsub.s32 2, %v1712_v46  ;;  %v1718_v54 = vrot.slane %v1709_v49, %v1717_v50 }
 0x10c   :  { %2414 = vmatprep.subr.mxu0 %v523_v16  ;;  %2449 = vmatprep.subr.mxu1 %v555_v17  ;;  %v1726_v55 = vrot.slane %v1709_v49, %v1725_v51  ;;  %p2467_p3 = por %p2466_p2, %p2465_p1 }
 0x10d   :  { %2415 = vmatpush3.msra.mxu0 %v507_v18  ;;  %2450 = vmatpush3.msra.mxu1 %v539_v19  ;;  %v853_v63 = vadd.f32 %v2037_v59, %v783_v58  ;;  %v1722_v53 = vrot.slane %v1709_v49, %v1721_v48 }
 0x10e   :  { %2416 = vmatprep.subr.mxu0 %v522_v20  ;;  %2451 = vmatprep.subr.mxu1 %v554_v21  ;;  %p2468_p4 = pnand %p2467_p3, %p2461_p0 }
 0x10f   :  { %2417 = vmatpush3.msra.mxu0 %v506_v22  ;;  %2452 = vmatpush3.msra.mxu1 %v538_v23 }
 0x110   :  { %2418 = vmatprep.subr.mxu0 %v521_v24  ;;  %2453 = vmatprep.subr.mxu1 %v553_v25 }
 0x111   :  { %2419 = vmatpush3.msra.mxu0 %v505_v26  ;;  %1620 = vmatprep.mubr.f32.mxu0 %v54_v27 }
 0x112   :  { %2454 = vmatpush3.msra.mxu1 %v537_v28  ;;  %1690 = vmatprep.mubr.f32.mxu1 %v56_v29 }
 0x113   :  { %1621 = vmatmul.mubr.f32.vlgmr.msra.gmra.mxu0 %v53_v30  ;;  %1691 = vmatmul.mubr.f32.vlgmr.msra.gmra.mxu1 %v55_v31 }
 0x114   :  { %1763 = vmatprep.subr.mxu0 %v1706_v32  ;;  %1834 = vmatprep.subr.mxu1 %v1708_v33 }
 0x115   :  { %1764 = vmatpush1.msra.mxu0 %v1705_v34  ;;  %1835 = vmatpush1.msra.mxu1 %v1707_v35 }
 0x116   :  { %1765 = vmatprep.subr.mxu0 %v1702_v36  ;;  %1836 = vmatprep.subr.mxu1 %v1704_v37 }
 0x117   :  { %1766 = vmatpush1.msra.mxu0 %v1701_v38  ;;  %1837 = vmatpush1.msra.mxu1 %v1703_v39 }
 0x118   :  { %1799 = vmatprep.mubr.f32.mxu0 %v2482_v40  ;;  %1870 = vmatprep.mubr.f32.mxu1 %v2482_v40 }
 0x128   :  { %v2070_v52 = vpop.f32.mrf.mxu0 }
 0x12a   :  { %v2105_v56 = vpop.f32.mrf.mxu1  ;;  %v2071_v57 = vpop.f32.mrf.mxu0 }
 0x12b   :  { %v2072_v61 = vadd.f32 %v2071_v57, %v2070_v52  ;;  %v1714_v52 = vrot.slane %v1709_v49, %v1713_v47 }
 0x12c   :  { %v2106_v62 = vpop.f32.mrf.mxu1 }
 0x12d   :  { %v923_v2 = vadd.f32 %v2072_v61, %v853_v63  ;;  %v2107_v3 = vadd.f32 %v2106_v62, %v2105_v56 }
 0x12f   :  { %v993_v7 = vadd.f32 %v2107_v3, %v923_v2 }
 0x14a   :  { %v2140_v60 = vpop.f32.mrf.mxu0 }
 0x14c   :  { %v2175_v0 = vpop.f32.mrf.mxu1  ;;  %v2141_v1 = vpop.f32.mrf.mxu0 }
 0x14d   :  { %v2142_v5 = vadd.f32 %v2141_v1, %v2140_v60 }
 0x14e   :  { %v2176_v6 = vpop.f32.mrf.mxu1 }
 0x14f   :  { %v1063_v10 = vadd.f32 %v2142_v5, %v993_v7  ;;  %v2177_v11 = vadd.f32 %v2176_v6, %v2175_v0 }
 0x151   :  { %v1133_v15 = vadd.f32 %v2177_v11, %v1063_v10 }
 0x16c   :  { %v2210_v4 = vpop.f32.mrf.mxu0 }
 0x16e   :  { %v2245_v8 = vpop.f32.mrf.mxu1  ;;  %v2211_v9 = vpop.f32.mrf.mxu0 }
 0x16f   :  { %v2212_v13 = vadd.f32 %v2211_v9, %v2210_v4 }
 0x170   :  { %v2246_v14 = vpop.f32.mrf.mxu1 }
 0x171   :  { %v1203_v18 = vadd.f32 %v2212_v13, %v1133_v15  ;;  %v2247_v19 = vadd.f32 %v2246_v14, %v2245_v8 }
 0x173   :  { %v1273_v23 = vadd.f32 %v2247_v19, %v1203_v18 }
 0x18e   :  { %v2280_v12 = vpop.f32.mrf.mxu0 }
 0x190   :  { %v2315_v16 = vpop.f32.mrf.mxu1  ;;  %v2281_v17 = vpop.f32.mrf.mxu0 }
 0x191   :  { %v2282_v21 = vadd.f32 %v2281_v17, %v2280_v12 }
 0x192   :  { %v2316_v22 = vpop.f32.mrf.mxu1 }
 0x193   :  { %v1343_v26 = vadd.f32 %v2282_v21, %v1273_v23  ;;  %v2317_v27 = vadd.f32 %v2316_v22, %v2315_v16 }
 0x195   :  { %v1413_v30 = vadd.f32 %v2317_v27, %v1343_v26 }
 0x1b0   :  { %v2350_v20 = vpop.f32.mrf.mxu0 }
 0x1b2   :  { %v2385_v24 = vpop.f32.mrf.mxu1  ;;  %v2351_v25 = vpop.f32.mrf.mxu0 }
 0x1b3   :  { %v2352_v28 = vadd.f32 %v2351_v25, %v2350_v20 }
 0x1b4   :  { %v2386_v29 = vpop.f32.mrf.mxu1 }
 0x1b5   :  { %v1483_v31 = vadd.f32 %v2352_v28, %v1413_v30  ;;  %v2387_v32 = vadd.f32 %v2386_v29, %v2385_v24 }
 0x1b7   :  { %v1553_v37 = vadd.f32 %v2387_v32, %v1483_v31 }
 0x1d3   :  { %v2420_v33 = vpop.f32.mrf.mxu0  ;;  %v2455_v34 = vpop.f32.mrf.mxu1 }
 0x1d5   :  { %v2421_v35 = vpop.f32.mrf.mxu0  ;;  %v2456_v36 = vpop.f32.mrf.mxu1 }
 0x1d6   :  { %v2422_v38 = vadd.f32 %v2421_v35, %v2420_v33  ;;  %v2457_v40 = vadd.f32 %v2456_v36, %v2455_v34 }
 0x1d8   :  { %v1623_v39 = vadd.f32 %v2422_v38, %v1553_v37 }
 0x1da   :  { %v1693_v42 = vadd.f32 %v2457_v40, %v1623_v39 }
 0x1dc   :  { %vm1697_vm0 = vcmp.ge.f32.partialorder %v1693_v42, 0.0  ;;  %v1699_v43 = vmul.f32 %v1698_v41, %v1693_v42 }
 0x1de   :  { %v1700_v44 = vsel %vm1697_vm0, %v1693_v42, %v1699_v43 }
 0x1df   :  { %1896 = vmatmul.mubr.msk.f32.vlgmr.msra.gmra.mxu0 %vm1731_vm1, %v1700_v44  ;;  %1897 = vmatmul.mubr.msk.f32.vlgmr.msra.gmra.mxu1 %vm1731_vm1, %v1700_v44 }
 0x29f   :  { %v1801_v56 = vpop.f32.mrf.mxu0  ;;  %v1872_v57 = vpop.f32.mrf.mxu1 }
 0x2a0   :  { %v1802_v58 = vadd.f32 %v1801_v56, %v1714_v52  ;;  %v1873_v59 = vadd.f32 %v1872_v57, %v1722_v53 }
 0x2a1   :  { %v1803_v60 = vpop.f32.mrf.mxu0  ;;  %v1874_v61 = vpop.f32.mrf.mxu1 }
 0x2a2   :  { %1877 = vst [vmem:[#allocation3] sm:$0xff] %v1802_v58  ;;  %1879 = vst [vmem:[#allocation3 + $0x10] sm:$0xff] %v1873_v59  ;;  %v1804_v62 = vadd.f32 %v1803_v60, %v1718_v54  ;;  %v1875_v63 = vadd.f32 %v1874_v61, %v1726_v55 }
 0x2a4   :  { %1878 = vst [vmem:[#allocation3 + $0x8] sm:$0xff] %v1804_v62  ;;  %1880 = vst [vmem:[#allocation3 + $0x18] sm:$0xff] %v1875_v63 }
 0x2a5   :  { %2471 = shalt.err (!%p2468_p4)
}
 0x2a6   :  { %1890 = dma.vmem_to_hbm [thread:$0]  %s1888_s23, 512, %s4193_s6, [#allocation4]  }
 0x2a7   :  { %2480 = dma.done.wait [#allocation4], 512  }
 0x2a8   :  { %2481 = vsyncadd [#allocation4], 4294966784 }
 0x2a9   :  { %1894 = vsyncpa [#allocation4], 1 }

</bundles_post_ra>
